<compile_context>
chip_gen: v7x
topology: tpu7x:2x2x1
jax: 0.10.0
libtpu: 0.0.40
codegen_flags: <defaults>
</compile_context>

<pallas_src>
import functools
import math

import jax
import jax.numpy as jnp
from jax.experimental import pallas as pl
from jax.experimental.pallas import tpu as pltpu


# ------------------------------------------------------------------ tiling helpers

def _round_up(x, m):
    return ((x + m - 1) // m) * m


def _tile_and_pad(dim, pref, align):
    """Pick a tile for `dim` and the (possibly padded) extent to use.

    Returns (tile, padded_dim).  If dim <= pref the whole (unpadded) dim is one
    block (block == full array extent is always legal).  Otherwise prefer an
    exact divisor that is a multiple of `align`; if none exists, pad the dim to
    a multiple of the aligned preferred tile (padding is zero-filled in the
    wrappers, so results are exact after slicing the output).
    """
    if dim <= pref:
        return dim, dim
    t = (pref // align) * align
    d = t
    while d >= align:
        if dim % d == 0:
            return d, dim
        d -= align
    return t, _round_up(dim, t)


def _pick_divisor_tile(dim, pref, align):
    """Largest tile <= pref that is a multiple of `align` and divides `dim`,
    else the full dim as a single block."""
    if dim <= pref:
        return dim
    t = (pref // align) * align
    while t >= align:
        if dim % t == 0:
            return t
        t -= align
    return dim   # TODO(synk): pad + mask ragged sequence blocks instead.


# bf16 MXU tiles: double-buffered live set at 512^3 is ~4.3 MiB
# (x 1 MiB + w 1 MiB + f32 out 2 MiB + bias), under the 32 MiB scoped default
# on all generations and v7x's 64 MiB physical VMEM.
_TM, _TN, _TK = 512, 512, 512
_LN_TM = 1024          # fused add+LayerNorm is HBM-bandwidth bound


# ------------------------------------------------------------------------- kernels

def _linear_kernel(x_ref, w_ref, b_ref, o_ref, *, relu):
    """o (tm,tn,f32) += x (tm,tk,bf16) @ w (tk,tn,bf16); bias/ReLU at last k.
    The output block is resident across the k axis (its index_map ignores k),
    so it doubles as the f32 accumulator -- no scratch, no final copy."""
    k = pl.program_id(2)

    @pl.when(k == 0)
    def _():
        o_ref[...] = jnp.zeros_like(o_ref)

    o_ref[...] += jnp.dot(x_ref[...], w_ref[...],
                          preferred_element_type=jnp.float32)

    @pl.when(k == pl.num_programs(2) - 1)
    def _():
        r = o_ref[...] + b_ref[...]
        if relu:
            r = jnp.maximum(r, 0.0)
        o_ref[...] = r


def _linear_split_kernel(x_ref, w_ref, b_ref, o_ref):
    """Same matmul, but the output block is (1,tm,tn): the N axis is routed by
    the out BlockSpec into an (n_split, M, d) slab (fused QKV / KV projection)."""
    k = pl.program_id(2)

    @pl.when(k == 0)
    def _():
        o_ref[...] = jnp.zeros_like(o_ref)

    o_ref[0] += jnp.dot(x_ref[...], w_ref[...],
                        preferred_element_type=jnp.float32)

    @pl.when(k == pl.num_programs(2) - 1)
    def _():
        o_ref[0] = o_ref[0] + b_ref[...]


def _add_layernorm_kernel(x_ref, y_ref, g_ref, b_ref, o_ref, *, eps):
    # Fused residual add + LayerNorm over the feature dim, all in f32.
    z = x_ref[...] + y_ref[...]
    mu = jnp.mean(z, axis=-1, keepdims=True)
    var = jnp.mean((z - mu) ** 2, axis=-1, keepdims=True)
    o_ref[...] = (z - mu) * jax.lax.rsqrt(var + eps) * g_ref[...] + b_ref[...]


def _mha_kernel(*refs, scale, has_kmask, has_qmask):
    """Per-(batch, head, q-tile) flash attention, streaming kv tiles.

    Blocks: q (1,1,tq,Dh) bf16, k/v (1,1,tkv,Dh) bf16, kmask (1,1,tkv) f32,
    qmask (1,tq,1) f32, out (1,1,tq,Dh) f32.  Scores/softmax stay f32 (v5e has
    no bf16 VPU/EUP); only the two MXU contractions run in bf16.
    """
    it = iter(refs)
    q_ref = next(it)
    k_ref = next(it)
    v_ref = next(it)
    km_ref = next(it) if has_kmask else None
    qm_ref = next(it) if has_qmask else None
    o_ref = next(it)
    m_scr = next(it)
    l_scr = next(it)
    acc_scr = next(it)

    kv = pl.program_id(3)

    @pl.when(kv == 0)
    def _():
        m_scr[...] = jnp.full_like(m_scr, -1e30)
        l_scr[...] = jnp.zeros_like(l_scr)
        acc_scr[...] = jnp.zeros_like(acc_scr)

    q = q_ref[0, 0]                      # (tq, Dh)  bf16
    k = k_ref[0, 0]                      # (tkv, Dh) bf16
    v = v_ref[0, 0]                      # (tkv, Dh) bf16

    s = jax.lax.dot_general(q, k,
                            dimension_numbers=(((1,), (1,)), ((), ())),
                            preferred_element_type=jnp.float32)   # (tq, tkv) f32
    s = s * scale
    if has_kmask:                         # key padding: 0 -> -1e9   (f32 add)
        s = s + (km_ref[0] - 1.0) * 1e9
    if has_qmask:                         # query padding: 0 -> -1e9 (f32 add)
        s = s + (qm_ref[0] - 1.0) * 1e9

    m_prev = m_scr[...]
    m_new = jnp.maximum(m_prev, jnp.max(s, axis=-1, keepdims=True))
    alpha = jnp.exp(m_prev - m_new)
    p = jnp.exp(s - m_new)
    l_scr[...] = alpha * l_scr[...] + jnp.sum(p, axis=-1, keepdims=True)
    acc_scr[...] = alpha * acc_scr[...] + jnp.dot(
        p.astype(v.dtype), v, preferred_element_type=jnp.float32)
    m_scr[...] = m_new

    @pl.when(kv == pl.num_programs(3) - 1)
    def _():
        # TODO(synk): switch to exact divide when bit-matching a reference.
        inv_l = pl.reciprocal(l_scr[...], approx=True)
        o_ref[0, 0] = (acc_scr[...] * inv_l).astype(o_ref.dtype)


# ------------------------------------------------------------------------ wrappers

def linear(x2d, w, b, relu=False):
    """y = x2d @ w + b (optional ReLU).  bf16 MXU operands, f32 accumulation."""
    M, K = x2d.shape
    N = w.shape[1]
    tm, Mp = _tile_and_pad(M, _TM, 16)        # 16: bf16 sublane packing
    tn, Np = _tile_and_pad(N, _TN, 128)
    tk, Kp = _tile_and_pad(K, _TK, 128)

    xb = x2d.astype(jnp.bfloat16)
    wb = w.astype(jnp.bfloat16)
    bb = b.reshape(1, N).astype(jnp.float32)
    if Mp != M or Kp != K:
        xb = jnp.pad(xb, ((0, Mp - M), (0, Kp - K)))
    if Kp != K or Np != N:
        wb = jnp.pad(wb, ((0, Kp - K), (0, Np - N)))
    if Np != N:
        bb = jnp.pad(bb, ((0, 0), (0, Np - N)))

    out = pl.pallas_call(
        functools.partial(_linear_kernel, relu=relu),
        out_shape=jax.ShapeDtypeStruct((Mp, Np), jnp.float32),
        grid=(Mp // tm, Np // tn, Kp // tk),
        in_specs=[pl.BlockSpec((tm, tk), lambda i, j, k: (i, k)),
                  pl.BlockSpec((tk, tn), lambda i, j, k: (k, j)),
                  pl.BlockSpec((1, tn), lambda i, j, k: (0, j))],
        out_specs=pl.BlockSpec((tm, tn), lambda i, j, k: (i, j)),
        compiler_params=pltpu.CompilerParams(
            dimension_semantics=("parallel", "parallel", "arbitrary")),
    )(xb, wb, bb)
    if Mp != M or Np != N:
        out = out[:M, :N]
    return out


def linear_split(x2d, w, b, n_split):
    """Fused projection x (M,K) @ w (K, n_split*d) + b written as (n_split, M, d)
    so q/k/v land in separate leading slices (no HBM re-slicing of the matmul)."""
    M, K = x2d.shape
    N = w.shape[1]
    d = N // n_split
    if d % 128 != 0:
        # Lane-legal split tiling needs d to be a 128-multiple; tiny configs
        # (like the toy run below) fall back to one matmul + an XLA relayout.
        out = linear(x2d, w, b)
        return out.reshape(M, n_split, d).transpose(1, 0, 2)

    tn = _pick_divisor_tile(d, _TN, 128)      # 128-multiple divisor of d
    tm, Mp = _tile_and_pad(M, _TM, 16)
    tk, Kp = _tile_and_pad(K, _TK, 128)

    xb = x2d.astype(jnp.bfloat16)
    wb = w.astype(jnp.bfloat16)
    if Mp != M or Kp != K:
        xb = jnp.pad(xb, ((0, Mp - M), (0, Kp - K)))
    if Kp != K:
        wb = jnp.pad(wb, ((0, Kp - K), (0, 0)))

    npd = d // tn
    out = pl.pallas_call(
        _linear_split_kernel,
        out_shape=jax.ShapeDtypeStruct((n_split, Mp, d), jnp.float32),
        grid=(Mp // tm, N // tn, Kp // tk),
        in_specs=[pl.BlockSpec((tm, tk), lambda i, j, k: (i, k)),
                  pl.BlockSpec((tk, tn), lambda i, j, k: (k, j)),
                  pl.BlockSpec((1, tn), lambda i, j, k: (0, j))],
        out_specs=pl.BlockSpec((1, tm, tn),
                               lambda i, j, k: (j // npd, i, j % npd)),
        compiler_params=pltpu.CompilerParams(
            dimension_semantics=("parallel", "parallel", "arbitrary")),
    )(xb, wb, b.reshape(1, N).astype(jnp.float32))
    if Mp != M:
        out = out[:, :M, :]
    return out


def add_layer_norm(x, y, gamma, beta, eps=1e-5):
    """LayerNorm(x + y) with the residual add fused into the kernel (all f32)."""
    B, S, D = x.shape
    M = B * S
    tm, Mp = _tile_and_pad(M, _LN_TM, 8)
    xf = x.reshape(M, D)
    yf = y.reshape(M, D)
    if Mp != M:
        xf = jnp.pad(xf, ((0, Mp - M), (0, 0)))
        yf = jnp.pad(yf, ((0, Mp - M), (0, 0)))
    out = pl.pallas_call(
        functools.partial(_add_layernorm_kernel, eps=eps),
        out_shape=jax.ShapeDtypeStruct((Mp, D), jnp.float32),
        grid=(Mp // tm,),
        in_specs=[pl.BlockSpec((tm, D), lambda i: (i, 0)),
                  pl.BlockSpec((tm, D), lambda i: (i, 0)),
                  pl.BlockSpec((1, D), lambda i: (0, 0)),
                  pl.BlockSpec((1, D), lambda i: (0, 0))],
        out_specs=pl.BlockSpec((tm, D), lambda i: (i, 0)),
        compiler_params=pltpu.CompilerParams(dimension_semantics=("parallel",)),
    )(xf, yf, gamma.reshape(1, D), beta.reshape(1, D))
    if Mp != M:
        out = out[:M]
    return out.reshape(B, S, D)


def _mha(q, k, v, kmask=None, qmask=None):
    """Flash multi-head attention.  q,k,v: (B,H,S,Dh) bf16.
    kmask: (B, Sk) key padding (or None), qmask: (B, Sq) query padding (or None).
    Returns (B, H, Sq, Dh) f32."""
    B, H, Sq, Dh = q.shape
    Sk = k.shape[2]
    scale = 1.0 / math.sqrt(Dh)
    tq = _pick_divisor_tile(Sq, 256, 16)
    tkv = _pick_divisor_tile(Sk, 512, 128)
    grid = (B, H, Sq // tq, Sk // tkv)

    in_specs = [
        pl.BlockSpec((1, 1, tq, Dh), lambda b, h, qi, kv: (b, h, qi, 0)),
        pl.BlockSpec((1, 1, tkv, Dh), lambda b, h, qi, kv: (b, h, kv, 0)),
        pl.BlockSpec((1, 1, tkv, Dh), lambda b, h, qi, kv: (b, h, kv, 0)),
    ]
    args = [q, k, v]
    if kmask is not None:
        in_specs.append(pl.BlockSpec((1, 1, tkv), lambda b, h, qi, kv: (b, 0, kv)))
        args.append(kmask.reshape(B, 1, Sk).astype(jnp.float32))
    if qmask is not None:
        in_specs.append(pl.BlockSpec((1, tq, 1), lambda b, h, qi, kv: (b, qi, 0)))
        args.append(qmask.reshape(B, Sq, 1).astype(jnp.float32))

    return pl.pallas_call(
        functools.partial(_mha_kernel, scale=scale,
                          has_kmask=kmask is not None,
                          has_qmask=qmask is not None),
        out_shape=jax.ShapeDtypeStruct((B, H, Sq, Dh), jnp.float32),
        grid=grid,
        in_specs=in_specs,
        out_specs=pl.BlockSpec((1, 1, tq, Dh), lambda b, h, qi, kv: (b, h, qi, 0)),
        scratch_shapes=[pltpu.VMEM((tq, 1), jnp.float32),
                        pltpu.VMEM((tq, 1), jnp.float32),
                        pltpu.VMEM((tq, Dh), jnp.float32)],
        compiler_params=pltpu.CompilerParams(
            dimension_semantics=("parallel", "parallel", "parallel", "arbitrary")),
    )(*args)


# --------------------------------------------------------------------------- model

def _split_heads(x_nmd, B, S, H):
    """(n, B*S, D) -> (n, B, H, S, Dh)."""
    n, _, D = x_nmd.shape
    Dh = D // H
    return x_nmd.reshape(n, B, S, H, Dh).transpose(0, 1, 3, 2, 4)


def self_attention(x, p, heads, kmask=None, qmask=None):
    B, S, D = x.shape
    qkv = linear_split(x.reshape(B * S, D), p["wqkv"], p["bqkv"], 3)   # (3, B*S, D)
    qkv = _split_heads(qkv, B, S, heads).astype(jnp.bfloat16)          # (3,B,H,S,Dh)
    o = _mha(qkv[0], qkv[1], qkv[2], kmask=kmask, qmask=qmask)         # (B,H,S,Dh)
    o = o.transpose(0, 2, 1, 3).reshape(B * S, D)
    return linear(o, p["wo"], p["bo"]).reshape(B, S, D)


def cross_attention(x_q, x_kv, p, heads, kmask=None, qmask=None):
    B, Sq, D = x_q.shape
    Sk = x_kv.shape[1]
    Dh = D // heads
    q = linear(x_q.reshape(B * Sq, D), p["wq"], p["bq"])
    q = q.reshape(B, Sq, heads, Dh).transpose(0, 2, 1, 3).astype(jnp.bfloat16)
    kv = linear_split(x_kv.reshape(B * Sk, D), p["wkv"], p["bkv"], 2)  # (2, B*Sk, D)
    kv = _split_heads(kv, B, Sk, heads).astype(jnp.bfloat16)           # (2,B,H,Sk,Dh)
    o = _mha(q, kv[0], kv[1], kmask=kmask, qmask=qmask)
    o = o.transpose(0, 2, 1, 3).reshape(B * Sq, D)
    return linear(o, p["wo"], p["bo"]).reshape(B, Sq, D)


def feed_forward(x, p):
    B, S, D = x.shape
    h = linear(x.reshape(B * S, D), p["w1"], p["b1"], relu=True)
    return linear(h, p["w2"], p["b2"]).reshape(B, S, D)


def encoder_layer(x, p, in_kmask, heads):
    attn = self_attention(x, p["attn"], heads, kmask=in_kmask, qmask=None)
    x = add_layer_norm(x, attn, p["ln1_g"], p["ln1_b"])
    ff = feed_forward(x, p["ff"])
    x = add_layer_norm(x, ff, p["ln2_g"], p["ln2_b"])
    return x


def decoder_layer(y, enc, p, in_kmask, out_qmask, heads):
    sa = self_attention(y, p["self_attn"], heads, kmask=None, qmask=out_qmask)
    y = add_layer_norm(y, sa, p["ln1_g"], p["ln1_b"])
    ca = cross_attention(y, enc, p["cross_attn"], heads, kmask=in_kmask, qmask=None)
    y = add_layer_norm(y, ca, p["ln2_g"], p["ln2_b"])
    ff = feed_forward(y, p["ff"])
    y = add_layer_norm(y, ff, p["ln3_g"], p["ln3_b"])
    return y


def positional_encoding(seq_len, embed):
    pos = jnp.arange(seq_len, dtype=jnp.float32)[:, None]
    i = jnp.arange(embed, dtype=jnp.float32)[None, :]
    angle = pos / jnp.power(10000.0, (2.0 * jnp.floor(i / 2.0)) / embed)
    return jnp.where((jnp.arange(embed)[None, :] % 2) == 0,
                     jnp.sin(angle), jnp.cos(angle)).astype(jnp.float32)


def transformer_forward(params, inp_ids, out_ids, heads):
    emb = params["embedding"]
    pe = params["pe"]

    ip_embed = jnp.take(emb, inp_ids, axis=0) + pe[None, : inp_ids.shape[1]]
    op_embed = jnp.take(emb, out_ids, axis=0) + pe[None, : out_ids.shape[1]]

    # Faithful port of generate_masks, INCLUDING the PyTorch bug where
    # seq_length = output_mask.size(1) == 1, so no causal (future-hiding) mask
    # is applied.  The 4-D masks then factor exactly into per-batch vectors:
    #   input_mask  (B,1,1,S_in)  -> key-padding vector over the source
    #   output_mask (B,1,S_out,1) -> query-padding vector over the target
    in_kmask = (inp_ids != 0).astype(jnp.float32)    # (B, S_in)
    out_qmask = (out_ids != 0).astype(jnp.float32)   # (B, S_out)

    enc = encoder_layer(ip_embed, params["encoder"], in_kmask, heads)
    dec = decoder_layer(op_embed, enc, params["decoder"], in_kmask, out_qmask, heads)

    # Weight-tied output projection: logits = dec @ E^T + b.  E is transposed
    # once per forward in HBM (one pass) so the matmul kernel stays in its
    # natural (K, N) orientation with a lane-dense, padded-if-needed vocab axis.
    B, S, D = dec.shape
    logits = linear(dec.reshape(B * S, D), emb.T, params["out_bias"])
    return logits.reshape(B, S, emb.shape[0])


# -------------------------------------------------------------------------- params

def _init_self_attn(key, d):
    kq, kk, kv, ko = jax.random.split(key, 4)
    wq = 0.02 * jax.random.normal(kq, (d, d), jnp.float32)
    wk = 0.02 * jax.random.normal(kk, (d, d), jnp.float32)
    wv = 0.02 * jax.random.normal(kv, (d, d), jnp.float32)
    return {
        "wqkv": jnp.concatenate([wq, wk, wv], axis=1),   # fused (D, 3D)
        "bqkv": jnp.zeros((3 * d,), jnp.float32),
        "wo": 0.02 * jax.random.normal(ko, (d, d), jnp.float32),
        "bo": jnp.zeros((d,), jnp.float32),
    }


def _init_cross_attn(key, d):
    kq, kk, kv, ko = jax.random.split(key, 4)
    wk = 0.02 * jax.random.normal(kk, (d, d), jnp.float32)
    wv = 0.02 * jax.random.normal(kv, (d, d), jnp.float32)
    return {
        "wq": 0.02 * jax.random.normal(kq, (d, d), jnp.float32),
        "bq": jnp.zeros((d,), jnp.float32),
        "wkv": jnp.concatenate([wk, wv], axis=1),        # fused (D, 2D)
        "bkv": jnp.zeros((2 * d,), jnp.float32),
        "wo": 0.02 * jax.random.normal(ko, (d, d), jnp.float32),
        "bo": jnp.zeros((d,), jnp.float32),
    }


def _init_ff(key, d, ff):
    k1, k2 = jax.random.split(key)
    return {
        "w1": 0.02 * jax.random.normal(k1, (d, ff), jnp.float32),
        "b1": jnp.zeros((ff,), jnp.float32),
        "w2": 0.02 * jax.random.normal(k2, (ff, d), jnp.float32),
        "b2": jnp.zeros((d,), jnp.float32),
    }


def init_params(key, vocab, embed, ff_dim, seq_len):
    keys = jax.random.split(key, 8)
    return {
        "embedding": 0.02 * jax.random.normal(keys[0], (vocab, embed), jnp.float32),
        "pe": positional_encoding(seq_len, embed),
        "out_bias": jnp.zeros((vocab,), jnp.float32),
        "encoder": {
            "attn": _init_self_attn(keys[1], embed),
            "ff": _init_ff(keys[2], embed, ff_dim),
            "ln1_g": jnp.ones((embed,), jnp.float32), "ln1_b": jnp.zeros((embed,), jnp.float32),
            "ln2_g": jnp.ones((embed,), jnp.float32), "ln2_b": jnp.zeros((embed,), jnp.float32),
        },
        "decoder": {
            "self_attn": _init_self_attn(keys[3], embed),
            "cross_attn": _init_cross_attn(keys[4], embed),
            "ff": _init_ff(keys[5], embed, ff_dim),
            "ln1_g": jnp.ones((embed,), jnp.float32), "ln1_b": jnp.zeros((embed,), jnp.float32),
            "ln2_g": jnp.ones((embed,), jnp.float32), "ln2_b": jnp.zeros((embed,), jnp.float32),
            "ln3_g": jnp.ones((embed,), jnp.float32), "ln3_b": jnp.zeros((embed,), jnp.float32),
        },
    }


# ---------------------------------------------------------------------------- main

if __name__ == "__main__":
    vocab_size, embed_size, heads, ff_dim, seq_len = 16, 32, 4, 64, 8
    batch = 2

    key = jax.random.PRNGKey(0)
    k_param, k_in, k_out = jax.random.split(key, 3)

    params = init_params(k_param, vocab_size, embed_size, ff_dim, seq_len)
    inp_ids = jax.random.randint(k_in, (batch, seq_len), 0, vocab_size, dtype=jnp.int32)
    out_ids = jax.random.randint(k_out, (batch, seq_len), 0, vocab_size, dtype=jnp.int32)

    fwd = jax.jit(functools.partial(transformer_forward, heads=heads))
    logits = fwd(params, inp_ids, out_ids)
    jax.block_until_ready(logits)

    assert logits.shape == (batch, seq_len, vocab_size)
    assert bool(jnp.all(jnp.isfinite(logits)))
    print("KERNEL_OK")
</pallas_src>

<mosaic_0001>
module attributes {stable_mosaic.version = 11 : i64} {
  func.func @_linear_kernel(%arg0: i32, %arg1: i32, %arg2: i32, %arg3: memref<16x32xbf16, #tpu.memory_space<vmem>>, %arg4: memref<32x96xbf16, #tpu.memory_space<vmem>>, %arg5: memref<1x96xf32, #tpu.memory_space<vmem>>, %arg6: memref<16x96xf32, #tpu.memory_space<vmem>>) attributes {dimension_semantics = [#tpu.dimension_semantics<parallel>, #tpu.dimension_semantics<parallel>, #tpu.dimension_semantics<arbitrary>], iteration_bounds = array<i64: 1, 1, 1>, scalar_prefetch = 0 : i64, scratch_operands = 0 : i64, tpu.core_type = #tpu.core_type<tc>, window_params = [{transform_indices = @transform_0, window_bounds = array<i64: 16, 32>}, {transform_indices = @transform_1, window_bounds = array<i64: 32, 96>}, {transform_indices = @transform_2, window_bounds = array<i64: 1, 96>}, {transform_indices = @transform_3, window_bounds = array<i64: 16, 96>}]} {
    %c0_i32 = arith.constant 0 : i32
    %0 = arith.cmpi eq, %arg2, %c0_i32 : i32
    %1 = arith.extui %0 : i1 to i32
    %c0_i32_0 = arith.constant 0 : i32
    %2 = arith.cmpi ne, %1, %c0_i32_0 : i32
    scf.if %2 {
      %cst_10 = arith.constant 0.000000e+00 : f32
      %12 = vector.broadcast %cst_10 : f32 to vector<16x96xf32>
      %c0_11 = arith.constant 0 : index
      %c0_12 = arith.constant 0 : index
      %13 = vector.load %arg6[%c0_11, %c0_12] : memref<16x96xf32, #tpu.memory_space<vmem>>, vector<16x96xf32>
      tpu.vector_store %arg6[%c0_11, %c0_12], %12 {strides = array<i32>} : memref<16x96xf32, #tpu.memory_space<vmem>>, vector<16x96xf32>,
    } else {
    }
    %c0 = arith.constant 0 : index
    %c0_1 = arith.constant 0 : index
    %3 = vector.load %arg6[%c0, %c0_1] : memref<16x96xf32, #tpu.memory_space<vmem>>, vector<16x96xf32>
    %c0_2 = arith.constant 0 : index
    %c0_3 = arith.constant 0 : index
    %4 = vector.load %arg3[%c0_2, %c0_3] : memref<16x32xbf16, #tpu.memory_space<vmem>>, vector<16x32xbf16>
    %c0_4 = arith.constant 0 : index
    %c0_5 = arith.constant 0 : index
    %5 = vector.load %arg4[%c0_4, %c0_5] : memref<32x96xbf16, #tpu.memory_space<vmem>>, vector<32x96xbf16>
    %cst = arith.constant dense<0.000000e+00> : vector<16x96xf32>
    %6 = tpu.matmul %4, %5, %cst {dimension_numbers = #tpu.dot_dimension_numbers<[1], [0], [0], [1], [0, 0, 1, 1], [], []>} : vector<16x32xbf16>, vector<32x96xbf16>, vector<16x96xf32> -> vector<16x96xf32>
    %7 = arith.addf %3, %6 : vector<16x96xf32>
    %c0_6 = arith.constant 0 : index
    %c0_7 = arith.constant 0 : index
    %8 = vector.load %arg6[%c0_6, %c0_7] : memref<16x96xf32, #tpu.memory_space<vmem>>, vector<16x96xf32>
    tpu.vector_store %arg6[%c0_6, %c0_7], %7 {strides = array<i32>} : memref<16x96xf32, #tpu.memory_space<vmem>>, vector<16x96xf32>,
    %c0_i32_8 = arith.constant 0 : i32
    %9 = arith.cmpi eq, %arg2, %c0_i32_8 : i32
    %10 = arith.extui %9 : i1 to i32
    %c0_i32_9 = arith.constant 0 : i32
    %11 = arith.cmpi ne, %10, %c0_i32_9 : i32
    scf.if %11 {
      %c0_10 = arith.constant 0 : index
      %c0_11 = arith.constant 0 : index
      %12 = vector.load %arg6[%c0_10, %c0_11] : memref<16x96xf32, #tpu.memory_space<vmem>>, vector<16x96xf32>
      %c0_12 = arith.constant 0 : index
      %c0_13 = arith.constant 0 : index
      %13 = vector.load %arg5[%c0_12, %c0_13] : memref<1x96xf32, #tpu.memory_space<vmem>>, vector<1x96xf32>
      %14 = vector.broadcast %13 : vector<1x96xf32> to vector<16x96xf32>
      %15 = arith.addf %12, %14 : vector<16x96xf32>
      %c0_14 = arith.constant 0 : index
      %c0_15 = arith.constant 0 : index
      %16 = vector.load %arg6[%c0_14, %c0_15] : memref<16x96xf32, #tpu.memory_space<vmem>>, vector<16x96xf32>
      tpu.vector_store %arg6[%c0_14, %c0_15], %15 {strides = array<i32>} : memref<16x96xf32, #tpu.memory_space<vmem>>, vector<16x96xf32>,
    } else {
    }
    return
  }
  func.func @transform_0(%arg0: i32, %arg1: i32, %arg2: i32) -> (i32, i32) {
    %c0_i32 = arith.constant 0 : i32
    return %arg0, %arg2 : i32, i32
  }
  func.func @transform_1(%arg0: i32, %arg1: i32, %arg2: i32) -> (i32, i32) {
    %c0_i32 = arith.constant 0 : i32
    return %arg2, %arg1 : i32, i32
  }
  func.func @transform_2(%arg0: i32, %arg1: i32, %arg2: i32) -> (i32, i32) {
    %c0_i32 = arith.constant 0 : i32
    %c0_i32_0 = arith.constant 0 : i32
    return %c0_i32, %arg1 : i32, i32
  }
  func.func @transform_3(%arg0: i32, %arg1: i32, %arg2: i32) -> (i32, i32) {
    %c0_i32 = arith.constant 0 : i32
    return %arg0, %arg1 : i32, i32
  }
}

module attributes {stable_mosaic.version = 11 : i64} {
  func.func @_mha_kernel(%arg0: i32, %arg1: i32, %arg2: i32, %arg3: i32, %arg4: memref<1x1x8x8xbf16, #tpu.memory_space<vmem>>, %arg5: memref<1x1x8x8xbf16, #tpu.memory_space<vmem>>, %arg6: memref<1x1x8x8xbf16, #tpu.memory_space<vmem>>, %arg7: memref<1x8x1xf32, #tpu.memory_space<vmem>>, %arg8: memref<1x1x8x8xf32, #tpu.memory_space<vmem>>, %arg9: memref<8x1xf32, #tpu.memory_space<vmem>>, %arg10: memref<8x1xf32, #tpu.memory_space<vmem>>, %arg11: memref<8x8xf32, #tpu.memory_space<vmem>>) attributes {dimension_semantics = [#tpu.dimension_semantics<parallel>, #tpu.dimension_semantics<parallel>, #tpu.dimension_semantics<parallel>, #tpu.dimension_semantics<arbitrary>], iteration_bounds = array<i64: 2, 4, 1, 1>, scalar_prefetch = 0 : i64, scratch_operands = 3 : i64, tpu.core_type = #tpu.core_type<tc>, window_params = [{transform_indices = @transform_0, window_bounds = array<i64: 1, 1, 8, 8>}, {transform_indices = @transform_1, window_bounds = array<i64: 1, 1, 8, 8>}, {transform_indices = @transform_2, window_bounds = array<i64: 1, 1, 8, 8>}, {transform_indices = @transform_3, window_bounds = array<i64: 1, 8, 1>}, {transform_indices = @transform_4, window_bounds = array<i64: 1, 1, 8, 8>}]} {
    %c0_i32 = arith.constant 0 : i32
    %0 = arith.cmpi eq, %arg3, %c0_i32 : i32
    %1 = arith.extui %0 : i1 to i32
    %c0_i32_0 = arith.constant 0 : i32
    %2 = arith.cmpi ne, %1, %c0_i32_0 : i32
    scf.if %2 {
      %cst_35 = arith.constant -1.000000e+30 : f32
      %46 = vector.broadcast %cst_35 : f32 to vector<8x1xf32>
      %c0_36 = arith.constant 0 : index
      %c0_37 = arith.constant 0 : index
      %47 = vector.load %arg9[%c0_36, %c0_37] : memref<8x1xf32, #tpu.memory_space<vmem>>, vector<8x1xf32>
      tpu.vector_store %arg9[%c0_36, %c0_37], %46 {strides = array<i32>} : memref<8x1xf32, #tpu.memory_space<vmem>>, vector<8x1xf32>,
      %cst_38 = arith.constant 0.000000e+00 : f32
      %48 = vector.broadcast %cst_38 : f32 to vector<8x1xf32>
      %c0_39 = arith.constant 0 : index
      %c0_40 = arith.constant 0 : index
      %49 = vector.load %arg10[%c0_39, %c0_40] : memref<8x1xf32, #tpu.memory_space<vmem>>, vector<8x1xf32>
      tpu.vector_store %arg10[%c0_39, %c0_40], %48 {strides = array<i32>} : memref<8x1xf32, #tpu.memory_space<vmem>>, vector<8x1xf32>,
      %cst_41 = arith.constant 0.000000e+00 : f32
      %50 = vector.broadcast %cst_41 : f32 to vector<8x8xf32>
      %c0_42 = arith.constant 0 : index
      %c0_43 = arith.constant 0 : index
      %51 = vector.load %arg11[%c0_42, %c0_43] : memref<8x8xf32, #tpu.memory_space<vmem>>, vector<8x8xf32>
      tpu.vector_store %arg11[%c0_42, %c0_43], %50 {strides = array<i32>} : memref<8x8xf32, #tpu.memory_space<vmem>>, vector<8x8xf32>,
    } else {
    }
    %c0 = arith.constant 0 : index
    %c0_1 = arith.constant 0 : index
    %c0_2 = arith.constant 0 : index
    %c0_3 = arith.constant 0 : index
    %3 = vector.load %arg4[%c0, %c0_1, %c0_2, %c0_3] : memref<1x1x8x8xbf16, #tpu.memory_space<vmem>>, vector<1x1x8x8xbf16>
    %4 = vector.shape_cast %3 : vector<1x1x8x8xbf16> to vector<8x8xbf16>
    %c0_4 = arith.constant 0 : index
    %c0_5 = arith.constant 0 : index
    %c0_6 = arith.constant 0 : index
    %c0_7 = arith.constant 0 : index
    %5 = vector.load %arg5[%c0_4, %c0_5, %c0_6, %c0_7] : memref<1x1x8x8xbf16, #tpu.memory_space<vmem>>, vector<1x1x8x8xbf16>
    %6 = vector.shape_cast %5 : vector<1x1x8x8xbf16> to vector<8x8xbf16>
    %c0_8 = arith.constant 0 : index
    %c0_9 = arith.constant 0 : index
    %c0_10 = arith.constant 0 : index
    %c0_11 = arith.constant 0 : index
    %7 = vector.load %arg6[%c0_8, %c0_9, %c0_10, %c0_11] : memref<1x1x8x8xbf16, #tpu.memory_space<vmem>>, vector<1x1x8x8xbf16>
    %8 = vector.shape_cast %7 : vector<1x1x8x8xbf16> to vector<8x8xbf16>
    %cst = arith.constant dense<0.000000e+00> : vector<8x8xf32>
    %9 = tpu.matmul %4, %6, %cst {dimension_numbers = #tpu.dot_dimension_numbers<[1], [1], [0], [0], [0, 0, 1, 0], [], []>} : vector<8x8xbf16>, vector<8x8xbf16>, vector<8x8xf32> -> vector<8x8xf32>
    %cst_12 = arith.constant 0.353553385 : f32
    %10 = vector.broadcast %cst_12 : f32 to vector<8x8xf32>
    %11 = arith.mulf %9, %10 : vector<8x8xf32>
    %c0_13 = arith.constant 0 : index
    %c0_14 = arith.constant 0 : index
    %c0_15 = arith.constant 0 : index
    %12 = vector.load %arg7[%c0_13, %c0_14, %c0_15] : memref<1x8x1xf32, #tpu.memory_space<vmem>>, vector<1x8x1xf32>
    %13 = vector.shape_cast %12 : vector<1x8x1xf32> to vector<8x1xf32>
    %cst_16 = arith.constant 1.000000e+00 : f32
    %14 = vector.broadcast %cst_16 : f32 to vector<8x1xf32>
    %15 = arith.subf %13, %14 : vector<8x1xf32>
    %cst_17 = arith.constant 1.000000e+09 : f32
    %16 = vector.broadcast %cst_17 : f32 to vector<8x1xf32>
    %17 = arith.mulf %15, %16 : vector<8x1xf32>
    %18 = vector.broadcast %17 : vector<8x1xf32> to vector<8x8xf32>
    %19 = arith.addf %11, %18 : vector<8x8xf32>
    %c0_18 = arith.constant 0 : index
    %c0_19 = arith.constant 0 : index
    %20 = vector.load %arg9[%c0_18, %c0_19] : memref<8x1xf32, #tpu.memory_space<vmem>>, vector<8x1xf32>
    %cst_20 = arith.constant dense<0xFF800000> : vector<8xf32>
    %21 = vector.multi_reduction <maximumf>, %19, %cst_20 [1] : vector<8x8xf32> to vector<8xf32>
    %22 = vector.shape_cast %21 : vector<8xf32> to vector<8x1xf32>
    %23 = arith.maximumf %20, %22 : vector<8x1xf32>
    %24 = arith.subf %20, %23 : vector<8x1xf32>
    %25 = math.exp %24 : vector<8x1xf32>
    %26 = vector.broadcast %23 : vector<8x1xf32> to vector<8x8xf32>
    %27 = arith.subf %19, %26 : vector<8x8xf32>
    %28 = math.exp %27 : vector<8x8xf32>
    %c0_21 = arith.constant 0 : index
    %c0_22 = arith.constant 0 : index
    %29 = vector.load %arg10[%c0_21, %c0_22] : memref<8x1xf32, #tpu.memory_space<vmem>>, vector<8x1xf32>
    %30 = arith.mulf %25, %29 : vector<8x1xf32>
    %cst_23 = arith.constant dense<0.000000e+00> : vector<8xf32>
    %31 = vector.multi_reduction <add>, %28, %cst_23 [1] : vector<8x8xf32> to vector<8xf32>
    %32 = vector.shape_cast %31 : vector<8xf32> to vector<8x1xf32>
    %33 = arith.addf %30, %32 : vector<8x1xf32>
    %c0_24 = arith.constant 0 : index
    %c0_25 = arith.constant 0 : index
    %34 = vector.load %arg10[%c0_24, %c0_25] : memref<8x1xf32, #tpu.memory_space<vmem>>, vector<8x1xf32>
    tpu.vector_store %arg10[%c0_24, %c0_25], %33 {strides = array<i32>} : memref<8x1xf32, #tpu.memory_space<vmem>>, vector<8x1xf32>,
    %c0_26 = arith.constant 0 : index
    %c0_27 = arith.constant 0 : index
    %35 = vector.load %arg11[%c0_26, %c0_27] : memref<8x8xf32, #tpu.memory_space<vmem>>, vector<8x8xf32>
    %36 = vector.broadcast %25 : vector<8x1xf32> to vector<8x8xf32>
    %37 = arith.mulf %36, %35 : vector<8x8xf32>
    %38 = arith.truncf %28 : vector<8x8xf32> to vector<8x8xbf16>
    %cst_28 = arith.constant dense<0.000000e+00> : vector<8x8xf32>
    %39 = tpu.matmul %38, %8, %cst_28 {dimension_numbers = #tpu.dot_dimension_numbers<[1], [0], [0], [1], [0, 0, 1, 1], [], []>} : vector<8x8xbf16>, vector<8x8xbf16>, vector<8x8xf32> -> vector<8x8xf32>
    %40 = arith.addf %37, %39 : vector<8x8xf32>
    %c0_29 = arith.constant 0 : index
    %c0_30 = arith.constant 0 : index
    %41 = vector.load %arg11[%c0_29, %c0_30] : memref<8x8xf32, #tpu.memory_space<vmem>>, vector<8x8xf32>
    tpu.vector_store %arg11[%c0_29, %c0_30], %40 {strides = array<i32>} : memref<8x8xf32, #tpu.memory_space<vmem>>, vector<8x8xf32>,
    %c0_31 = arith.constant 0 : index
    %c0_32 = arith.constant 0 : index
    %42 = vector.load %arg9[%c0_31, %c0_32] : memref<8x1xf32, #tpu.memory_space<vmem>>, vector<8x1xf32>
    tpu.vector_store %arg9[%c0_31, %c0_32], %23 {strides = array<i32>} : memref<8x1xf32, #tpu.memory_space<vmem>>, vector<8x1xf32>,
    %c0_i32_33 = arith.constant 0 : i32
    %43 = arith.cmpi eq, %arg3, %c0_i32_33 : i32
    %44 = arith.extui %43 : i1 to i32
    %c0_i32_34 = arith.constant 0 : i32
    %45 = arith.cmpi ne, %44, %c0_i32_34 : i32
    scf.if %45 {
      %c0_35 = arith.constant 0 : index
      %c0_36 = arith.constant 0 : index
      %46 = vector.load %arg10[%c0_35, %c0_36] : memref<8x1xf32, #tpu.memory_space<vmem>>, vector<8x1xf32>
      %47 = tpu.reciprocal %46 {approx = true} : vector<8x1xf32> -> vector<8x1xf32>
      %c0_37 = arith.constant 0 : index
      %c0_38 = arith.constant 0 : index
      %48 = vector.load %arg11[%c0_37, %c0_38] : memref<8x8xf32, #tpu.memory_space<vmem>>, vector<8x8xf32>
      %49 = vector.broadcast %47 : vector<8x1xf32> to vector<8x8xf32>
      %50 = arith.mulf %48, %49 : vector<8x8xf32>
      %c0_39 = arith.constant 0 : index
      %c0_40 = arith.constant 0 : index
      %c0_41 = arith.constant 0 : index
      %c0_42 = arith.constant 0 : index
      %51 = vector.load %arg8[%c0_39, %c0_40, %c0_41, %c0_42] : memref<1x1x8x8xf32, #tpu.memory_space<vmem>>, vector<1x1x8x8xf32>
      %52 = vector.shape_cast %51 : vector<1x1x8x8xf32> to vector<8x8xf32>
      %53 = vector.shape_cast %50 : vector<8x8xf32> to vector<1x1x8x8xf32>
      tpu.vector_store %arg8[%c0_39, %c0_40, %c0_41, %c0_42], %53 {strides = array<i32>} : memref<1x1x8x8xf32, #tpu.memory_space<vmem>>, vector<1x1x8x8xf32>,
    } else {
    }
    return
  }
  func.func @transform_0(%arg0: i32, %arg1: i32, %arg2: i32, %arg3: i32) -> (i32, i32, i32, i32) {
    %c0_i32 = arith.constant 0 : i32
    %c0_i32_0 = arith.constant 0 : i32
    return %arg0, %arg1, %arg2, %c0_i32 : i32, i32, i32, i32
  }
  func.func @transform_1(%arg0: i32, %arg1: i32, %arg2: i32, %arg3: i32) -> (i32, i32, i32, i32) {
    %c0_i32 = arith.constant 0 : i32
    %c0_i32_0 = arith.constant 0 : i32
    return %arg0, %arg1, %arg3, %c0_i32 : i32, i32, i32, i32
  }
  func.func @transform_2(%arg0: i32, %arg1: i32, %arg2: i32, %arg3: i32) -> (i32, i32, i32, i32) {
    %c0_i32 = arith.constant 0 : i32
    %c0_i32_0 = arith.constant 0 : i32
    return %arg0, %arg1, %arg3, %c0_i32 : i32, i32, i32, i32
  }
  func.func @transform_3(%arg0: i32, %arg1: i32, %arg2: i32, %arg3: i32) -> (i32, i32, i32) {
    %c0_i32 = arith.constant 0 : i32
    %c0_i32_0 = arith.constant 0 : i32
    return %arg0, %arg2, %c0_i32 : i32, i32, i32
  }
  func.func @transform_4(%arg0: i32, %arg1: i32, %arg2: i32, %arg3: i32) -> (i32, i32, i32, i32) {
    %c0_i32 = arith.constant 0 : i32
    %c0_i32_0 = arith.constant 0 : i32
    return %arg0, %arg1, %arg2, %c0_i32 : i32, i32, i32, i32
  }
}

module attributes {stable_mosaic.version = 11 : i64} {
  func.func @_linear_kernel(%arg0: i32, %arg1: i32, %arg2: i32, %arg3: memref<16x32xbf16, #tpu.memory_space<vmem>>, %arg4: memref<32x32xbf16, #tpu.memory_space<vmem>>, %arg5: memref<1x32xf32, #tpu.memory_space<vmem>>, %arg6: memref<16x32xf32, #tpu.memory_space<vmem>>) attributes {dimension_semantics = [#tpu.dimension_semantics<parallel>, #tpu.dimension_semantics<parallel>, #tpu.dimension_semantics<arbitrary>], iteration_bounds = array<i64: 1, 1, 1>, scalar_prefetch = 0 : i64, scratch_operands = 0 : i64, tpu.core_type = #tpu.core_type<tc>, window_params = [{transform_indices = @transform_0, window_bounds = array<i64: 16, 32>}, {transform_indices = @transform_1, window_bounds = array<i64: 32, 32>}, {transform_indices = @transform_2, window_bounds = array<i64: 1, 32>}, {transform_indices = @transform_3, window_bounds = array<i64: 16, 32>}]} {
    %c0_i32 = arith.constant 0 : i32
    %0 = arith.cmpi eq, %arg2, %c0_i32 : i32
    %1 = arith.extui %0 : i1 to i32
    %c0_i32_0 = arith.constant 0 : i32
    %2 = arith.cmpi ne, %1, %c0_i32_0 : i32
    scf.if %2 {
      %cst_10 = arith.constant 0.000000e+00 : f32
      %12 = vector.broadcast %cst_10 : f32 to vector<16x32xf32>
      %c0_11 = arith.constant 0 : index
      %c0_12 = arith.constant 0 : index
      %13 = vector.load %arg6[%c0_11, %c0_12] : memref<16x32xf32, #tpu.memory_space<vmem>>, vector<16x32xf32>
      tpu.vector_store %arg6[%c0_11, %c0_12], %12 {strides = array<i32>} : memref<16x32xf32, #tpu.memory_space<vmem>>, vector<16x32xf32>,
    } else {
    }
    %c0 = arith.constant 0 : index
    %c0_1 = arith.constant 0 : index
    %3 = vector.load %arg6[%c0, %c0_1] : memref<16x32xf32, #tpu.memory_space<vmem>>, vector<16x32xf32>
    %c0_2 = arith.constant 0 : index
    %c0_3 = arith.constant 0 : index
    %4 = vector.load %arg3[%c0_2, %c0_3] : memref<16x32xbf16, #tpu.memory_space<vmem>>, vector<16x32xbf16>
    %c0_4 = arith.constant 0 : index
    %c0_5 = arith.constant 0 : index
    %5 = vector.load %arg4[%c0_4, %c0_5] : memref<32x32xbf16, #tpu.memory_space<vmem>>, vector<32x32xbf16>
    %cst = arith.constant dense<0.000000e+00> : vector<16x32xf32>
    %6 = tpu.matmul %4, %5, %cst {dimension_numbers = #tpu.dot_dimension_numbers<[1], [0], [0], [1], [0, 0, 1, 1], [], []>} : vector<16x32xbf16>, vector<32x32xbf16>, vector<16x32xf32> -> vector<16x32xf32>
    %7 = arith.addf %3, %6 : vector<16x32xf32>
    %c0_6 = arith.constant 0 : index
    %c0_7 = arith.constant 0 : index
    %8 = vector.load %arg6[%c0_6, %c0_7] : memref<16x32xf32, #tpu.memory_space<vmem>>, vector<16x32xf32>
    tpu.vector_store %arg6[%c0_6, %c0_7], %7 {strides = array<i32>} : memref<16x32xf32, #tpu.memory_space<vmem>>, vector<16x32xf32>,
    %c0_i32_8 = arith.constant 0 : i32
    %9 = arith.cmpi eq, %arg2, %c0_i32_8 : i32
    %10 = arith.extui %9 : i1 to i32
    %c0_i32_9 = arith.constant 0 : i32
    %11 = arith.cmpi ne, %10, %c0_i32_9 : i32
    scf.if %11 {
      %c0_10 = arith.constant 0 : index
      %c0_11 = arith.constant 0 : index
      %12 = vector.load %arg6[%c0_10, %c0_11] : memref<16x32xf32, #tpu.memory_space<vmem>>, vector<16x32xf32>
      %c0_12 = arith.constant 0 : index
      %c0_13 = arith.constant 0 : index
      %13 = vector.load %arg5[%c0_12, %c0_13] : memref<1x32xf32, #tpu.memory_space<vmem>>, vector<1x32xf32>
      %14 = vector.broadcast %13 : vector<1x32xf32> to vector<16x32xf32>
      %15 = arith.addf %12, %14 : vector<16x32xf32>
      %c0_14 = arith.constant 0 : index
      %c0_15 = arith.constant 0 : index
      %16 = vector.load %arg6[%c0_14, %c0_15] : memref<16x32xf32, #tpu.memory_space<vmem>>, vector<16x32xf32>
      tpu.vector_store %arg6[%c0_14, %c0_15], %15 {strides = array<i32>} : memref<16x32xf32, #tpu.memory_space<vmem>>, vector<16x32xf32>,
    } else {
    }
    return
  }
  func.func @transform_0(%arg0: i32, %arg1: i32, %arg2: i32) -> (i32, i32) {
    %c0_i32 = arith.constant 0 : i32
    return %arg0, %arg2 : i32, i32
  }
  func.func @transform_1(%arg0: i32, %arg1: i32, %arg2: i32) -> (i32, i32) {
    %c0_i32 = arith.constant 0 : i32
    return %arg2, %arg1 : i32, i32
  }
  func.func @transform_2(%arg0: i32, %arg1: i32, %arg2: i32) -> (i32, i32) {
    %c0_i32 = arith.constant 0 : i32
    %c0_i32_0 = arith.constant 0 : i32
    return %c0_i32, %arg1 : i32, i32
  }
  func.func @transform_3(%arg0: i32, %arg1: i32, %arg2: i32) -> (i32, i32) {
    %c0_i32 = arith.constant 0 : i32
    return %arg0, %arg1 : i32, i32
  }
}

module attributes {stable_mosaic.version = 11 : i64} {
  func.func @_add_layernorm_kernel(%arg0: i32, %arg1: memref<16x32xf32, #tpu.memory_space<vmem>>, %arg2: memref<16x32xf32, #tpu.memory_space<vmem>>, %arg3: memref<1x32xf32, #tpu.memory_space<vmem>>, %arg4: memref<1x32xf32, #tpu.memory_space<vmem>>, %arg5: memref<16x32xf32, #tpu.memory_space<vmem>>) attributes {dimension_semantics = [#tpu.dimension_semantics<parallel>], iteration_bounds = array<i64: 1>, scalar_prefetch = 0 : i64, scratch_operands = 0 : i64, tpu.core_type = #tpu.core_type<tc>, window_params = [{transform_indices = @transform_0, window_bounds = array<i64: 16, 32>}, {transform_indices = @transform_1, window_bounds = array<i64: 16, 32>}, {pipeline_mode = #tpu.pipeline_mode<synchronous>, transform_indices = @transform_2, window_bounds = array<i64: 1, 32>}, {pipeline_mode = #tpu.pipeline_mode<synchronous>, transform_indices = @transform_3, window_bounds = array<i64: 1, 32>}, {transform_indices = @transform_4, window_bounds = array<i64: 16, 32>}]} {
    %c0 = arith.constant 0 : index
    %c0_0 = arith.constant 0 : index
    %0 = vector.load %arg1[%c0, %c0_0] : memref<16x32xf32, #tpu.memory_space<vmem>>, vector<16x32xf32>
    %c0_1 = arith.constant 0 : index
    %c0_2 = arith.constant 0 : index
    %1 = vector.load %arg2[%c0_1, %c0_2] : memref<16x32xf32, #tpu.memory_space<vmem>>, vector<16x32xf32>
    %2 = arith.addf %0, %1 : vector<16x32xf32>
    %cst = arith.constant dense<0.000000e+00> : vector<16xf32>
    %3 = vector.multi_reduction <add>, %2, %cst [1] : vector<16x32xf32> to vector<16xf32>
    %4 = vector.shape_cast %3 : vector<16xf32> to vector<16x1xf32>
    %cst_3 = arith.constant 3.200000e+01 : f32
    %5 = vector.broadcast %cst_3 : f32 to vector<16x1xf32>
    %6 = arith.divf %4, %5 : vector<16x1xf32>
    %7 = vector.broadcast %6 : vector<16x1xf32> to vector<16x32xf32>
    %8 = arith.subf %2, %7 : vector<16x32xf32>
    %9 = arith.mulf %8, %8 : vector<16x32xf32>
    %cst_4 = arith.constant dense<0.000000e+00> : vector<16xf32>
    %10 = vector.multi_reduction <add>, %9, %cst_4 [1] : vector<16x32xf32> to vector<16xf32>
    %11 = vector.shape_cast %10 : vector<16xf32> to vector<16x1xf32>
    %cst_5 = arith.constant 3.200000e+01 : f32
    %12 = vector.broadcast %cst_5 : f32 to vector<16x1xf32>
    %13 = arith.divf %11, %12 : vector<16x1xf32>
    %14 = vector.broadcast %6 : vector<16x1xf32> to vector<16x32xf32>
    %15 = arith.subf %2, %14 : vector<16x32xf32>
    %cst_6 = arith.constant 9.99999974E-6 : f32
    %16 = vector.broadcast %cst_6 : f32 to vector<16x1xf32>
    %17 = arith.addf %13, %16 : vector<16x1xf32>
    %18 = math.rsqrt %17 : vector<16x1xf32>
    %19 = vector.broadcast %18 : vector<16x1xf32> to vector<16x32xf32>
    %20 = arith.mulf %15, %19 : vector<16x32xf32>
    %c0_7 = arith.constant 0 : index
    %c0_8 = arith.constant 0 : index
    %21 = vector.load %arg3[%c0_7, %c0_8] : memref<1x32xf32, #tpu.memory_space<vmem>>, vector<1x32xf32>
    %22 = vector.broadcast %21 : vector<1x32xf32> to vector<16x32xf32>
    %23 = arith.mulf %20, %22 : vector<16x32xf32>
    %c0_9 = arith.constant 0 : index
    %c0_10 = arith.constant 0 : index
    %24 = vector.load %arg4[%c0_9, %c0_10] : memref<1x32xf32, #tpu.memory_space<vmem>>, vector<1x32xf32>
    %25 = vector.broadcast %24 : vector<1x32xf32> to vector<16x32xf32>
    %26 = arith.addf %23, %25 : vector<16x32xf32>
    %c0_11 = arith.constant 0 : index
    %c0_12 = arith.constant 0 : index
    %27 = vector.load %arg5[%c0_11, %c0_12] : memref<16x32xf32, #tpu.memory_space<vmem>>, vector<16x32xf32>
    tpu.vector_store %arg5[%c0_11, %c0_12], %26 {strides = array<i32>} : memref<16x32xf32, #tpu.memory_space<vmem>>, vector<16x32xf32>,
    return
  }
  func.func @transform_0(%arg0: i32) -> (i32, i32) {
    %c0_i32 = arith.constant 0 : i32
    %c0_i32_0 = arith.constant 0 : i32
    return %arg0, %c0_i32 : i32, i32
  }
  func.func @transform_1(%arg0: i32) -> (i32, i32) {
    %c0_i32 = arith.constant 0 : i32
    %c0_i32_0 = arith.constant 0 : i32
    return %arg0, %c0_i32 : i32, i32
  }
  func.func @transform_2(%arg0: i32) -> (i32, i32) {
    %c0_i32 = arith.constant 0 : i32
    %c0_i32_0 = arith.constant 0 : i32
    %c0_i32_1 = arith.constant 0 : i32
    return %c0_i32, %c0_i32_0 : i32, i32
  }
  func.func @transform_3(%arg0: i32) -> (i32, i32) {
    %c0_i32 = arith.constant 0 : i32
    %c0_i32_0 = arith.constant 0 : i32
    %c0_i32_1 = arith.constant 0 : i32
    return %c0_i32, %c0_i32_0 : i32, i32
  }
  func.func @transform_4(%arg0: i32) -> (i32, i32) {
    %c0_i32 = arith.constant 0 : i32
    %c0_i32_0 = arith.constant 0 : i32
    return %arg0, %c0_i32 : i32, i32
  }
}

module attributes {stable_mosaic.version = 11 : i64} {
  func.func @_mha_kernel(%arg0: i32, %arg1: i32, %arg2: i32, %arg3: i32, %arg4: memref<1x1x8x8xbf16, #tpu.memory_space<vmem>>, %arg5: memref<1x1x8x8xbf16, #tpu.memory_space<vmem>>, %arg6: memref<1x1x8x8xbf16, #tpu.memory_space<vmem>>, %arg7: memref<1x1x8xf32, #tpu.memory_space<vmem>>, %arg8: memref<1x1x8x8xf32, #tpu.memory_space<vmem>>, %arg9: memref<8x1xf32, #tpu.memory_space<vmem>>, %arg10: memref<8x1xf32, #tpu.memory_space<vmem>>, %arg11: memref<8x8xf32, #tpu.memory_space<vmem>>) attributes {dimension_semantics = [#tpu.dimension_semantics<parallel>, #tpu.dimension_semantics<parallel>, #tpu.dimension_semantics<parallel>, #tpu.dimension_semantics<arbitrary>], iteration_bounds = array<i64: 2, 4, 1, 1>, scalar_prefetch = 0 : i64, scratch_operands = 3 : i64, tpu.core_type = #tpu.core_type<tc>, window_params = [{transform_indices = @transform_0, window_bounds = array<i64: 1, 1, 8, 8>}, {transform_indices = @transform_1, window_bounds = array<i64: 1, 1, 8, 8>}, {transform_indices = @transform_2, window_bounds = array<i64: 1, 1, 8, 8>}, {transform_indices = @transform_3, window_bounds = array<i64: 1, 1, 8>}, {transform_indices = @transform_4, window_bounds = array<i64: 1, 1, 8, 8>}]} {
    %c0_i32 = arith.constant 0 : i32
    %0 = arith.cmpi eq, %arg3, %c0_i32 : i32
    %1 = arith.extui %0 : i1 to i32
    %c0_i32_0 = arith.constant 0 : i32
    %2 = arith.cmpi ne, %1, %c0_i32_0 : i32
    scf.if %2 {
      %cst_35 = arith.constant -1.000000e+30 : f32
      %46 = vector.broadcast %cst_35 : f32 to vector<8x1xf32>
      %c0_36 = arith.constant 0 : index
      %c0_37 = arith.constant 0 : index
      %47 = vector.load %arg9[%c0_36, %c0_37] : memref<8x1xf32, #tpu.memory_space<vmem>>, vector<8x1xf32>
      tpu.vector_store %arg9[%c0_36, %c0_37], %46 {strides = array<i32>} : memref<8x1xf32, #tpu.memory_space<vmem>>, vector<8x1xf32>,
      %cst_38 = arith.constant 0.000000e+00 : f32
      %48 = vector.broadcast %cst_38 : f32 to vector<8x1xf32>
      %c0_39 = arith.constant 0 : index
      %c0_40 = arith.constant 0 : index
      %49 = vector.load %arg10[%c0_39, %c0_40] : memref<8x1xf32, #tpu.memory_space<vmem>>, vector<8x1xf32>
      tpu.vector_store %arg10[%c0_39, %c0_40], %48 {strides = array<i32>} : memref<8x1xf32, #tpu.memory_space<vmem>>, vector<8x1xf32>,
      %cst_41 = arith.constant 0.000000e+00 : f32
      %50 = vector.broadcast %cst_41 : f32 to vector<8x8xf32>
      %c0_42 = arith.constant 0 : index
      %c0_43 = arith.constant 0 : index
      %51 = vector.load %arg11[%c0_42, %c0_43] : memref<8x8xf32, #tpu.memory_space<vmem>>, vector<8x8xf32>
      tpu.vector_store %arg11[%c0_42, %c0_43], %50 {strides = array<i32>} : memref<8x8xf32, #tpu.memory_space<vmem>>, vector<8x8xf32>,
    } else {
    }
    %c0 = arith.constant 0 : index
    %c0_1 = arith.constant 0 : index
    %c0_2 = arith.constant 0 : index
    %c0_3 = arith.constant 0 : index
    %3 = vector.load %arg4[%c0, %c0_1, %c0_2, %c0_3] : memref<1x1x8x8xbf16, #tpu.memory_space<vmem>>, vector<1x1x8x8xbf16>
    %4 = vector.shape_cast %3 : vector<1x1x8x8xbf16> to vector<8x8xbf16>
    %c0_4 = arith.constant 0 : index
    %c0_5 = arith.constant 0 : index
    %c0_6 = arith.constant 0 : index
    %c0_7 = arith.constant 0 : index
    %5 = vector.load %arg5[%c0_4, %c0_5, %c0_6, %c0_7] : memref<1x1x8x8xbf16, #tpu.memory_space<vmem>>, vector<1x1x8x8xbf16>
    %6 = vector.shape_cast %5 : vector<1x1x8x8xbf16> to vector<8x8xbf16>
    %c0_8 = arith.constant 0 : index
    %c0_9 = arith.constant 0 : index
    %c0_10 = arith.constant 0 : index
    %c0_11 = arith.constant 0 : index
    %7 = vector.load %arg6[%c0_8, %c0_9, %c0_10, %c0_11] : memref<1x1x8x8xbf16, #tpu.memory_space<vmem>>, vector<1x1x8x8xbf16>
    %8 = vector.shape_cast %7 : vector<1x1x8x8xbf16> to vector<8x8xbf16>
    %cst = arith.constant dense<0.000000e+00> : vector<8x8xf32>
    %9 = tpu.matmul %4, %6, %cst {dimension_numbers = #tpu.dot_dimension_numbers<[1], [1], [0], [0], [0, 0, 1, 0], [], []>} : vector<8x8xbf16>, vector<8x8xbf16>, vector<8x8xf32> -> vector<8x8xf32>
    %cst_12 = arith.constant 0.353553385 : f32
    %10 = vector.broadcast %cst_12 : f32 to vector<8x8xf32>
    %11 = arith.mulf %9, %10 : vector<8x8xf32>
    %c0_13 = arith.constant 0 : index
    %c0_14 = arith.constant 0 : index
    %c0_15 = arith.constant 0 : index
    %12 = vector.load %arg7[%c0_13, %c0_14, %c0_15] : memref<1x1x8xf32, #tpu.memory_space<vmem>>, vector<1x1x8xf32>
    %13 = vector.shape_cast %12 : vector<1x1x8xf32> to vector<1x8xf32>
    %cst_16 = arith.constant 1.000000e+00 : f32
    %14 = vector.broadcast %cst_16 : f32 to vector<1x8xf32>
    %15 = arith.subf %13, %14 : vector<1x8xf32>
    %cst_17 = arith.constant 1.000000e+09 : f32
    %16 = vector.broadcast %cst_17 : f32 to vector<1x8xf32>
    %17 = arith.mulf %15, %16 : vector<1x8xf32>
    %18 = vector.broadcast %17 : vector<1x8xf32> to vector<8x8xf32>
    %19 = arith.addf %11, %18 : vector<8x8xf32>
    %c0_18 = arith.constant 0 : index
    %c0_19 = arith.constant 0 : index
    %20 = vector.load %arg9[%c0_18, %c0_19] : memref<8x1xf32, #tpu.memory_space<vmem>>, vector<8x1xf32>
    %cst_20 = arith.constant dense<0xFF800000> : vector<8xf32>
    %21 = vector.multi_reduction <maximumf>, %19, %cst_20 [1] : vector<8x8xf32> to vector<8xf32>
    %22 = vector.shape_cast %21 : vector<8xf32> to vector<8x1xf32>
    %23 = arith.maximumf %20, %22 : vector<8x1xf32>
    %24 = arith.subf %20, %23 : vector<8x1xf32>
    %25 = math.exp %24 : vector<8x1xf32>
    %26 = vector.broadcast %23 : vector<8x1xf32> to vector<8x8xf32>
    %27 = arith.subf %19, %26 : vector<8x8xf32>
    %28 = math.exp %27 : vector<8x8xf32>
    %c0_21 = arith.constant 0 : index
    %c0_22 = arith.constant 0 : index
    %29 = vector.load %arg10[%c0_21, %c0_22] : memref<8x1xf32, #tpu.memory_space<vmem>>, vector<8x1xf32>
    %30 = arith.mulf %25, %29 : vector<8x1xf32>
    %cst_23 = arith.constant dense<0.000000e+00> : vector<8xf32>
    %31 = vector.multi_reduction <add>, %28, %cst_23 [1] : vector<8x8xf32> to vector<8xf32>
    %32 = vector.shape_cast %31 : vector<8xf32> to vector<8x1xf32>
    %33 = arith.addf %30, %32 : vector<8x1xf32>
    %c0_24 = arith.constant 0 : index
    %c0_25 = arith.constant 0 : index
    %34 = vector.load %arg10[%c0_24, %c0_25] : memref<8x1xf32, #tpu.memory_space<vmem>>, vector<8x1xf32>
    tpu.vector_store %arg10[%c0_24, %c0_25], %33 {strides = array<i32>} : memref<8x1xf32, #tpu.memory_space<vmem>>, vector<8x1xf32>,
    %c0_26 = arith.constant 0 : index
    %c0_27 = arith.constant 0 : index
    %35 = vector.load %arg11[%c0_26, %c0_27] : memref<8x8xf32, #tpu.memory_space<vmem>>, vector<8x8xf32>
    %36 = vector.broadcast %25 : vector<8x1xf32> to vector<8x8xf32>
    %37 = arith.mulf %36, %35 : vector<8x8xf32>
    %38 = arith.truncf %28 : vector<8x8xf32> to vector<8x8xbf16>
    %cst_28 = arith.constant dense<0.000000e+00> : vector<8x8xf32>
    %39 = tpu.matmul %38, %8, %cst_28 {dimension_numbers = #tpu.dot_dimension_numbers<[1], [0], [0], [1], [0, 0, 1, 1], [], []>} : vector<8x8xbf16>, vector<8x8xbf16>, vector<8x8xf32> -> vector<8x8xf32>
    %40 = arith.addf %37, %39 : vector<8x8xf32>
    %c0_29 = arith.constant 0 : index
    %c0_30 = arith.constant 0 : index
    %41 = vector.load %arg11[%c0_29, %c0_30] : memref<8x8xf32, #tpu.memory_space<vmem>>, vector<8x8xf32>
    tpu.vector_store %arg11[%c0_29, %c0_30], %40 {strides = array<i32>} : memref<8x8xf32, #tpu.memory_space<vmem>>, vector<8x8xf32>,
    %c0_31 = arith.constant 0 : index
    %c0_32 = arith.constant 0 : index
    %42 = vector.load %arg9[%c0_31, %c0_32] : memref<8x1xf32, #tpu.memory_space<vmem>>, vector<8x1xf32>
    tpu.vector_store %arg9[%c0_31, %c0_32], %23 {strides = array<i32>} : memref<8x1xf32, #tpu.memory_space<vmem>>, vector<8x1xf32>,
    %c0_i32_33 = arith.constant 0 : i32
    %43 = arith.cmpi eq, %arg3, %c0_i32_33 : i32
    %44 = arith.extui %43 : i1 to i32
    %c0_i32_34 = arith.constant 0 : i32
    %45 = arith.cmpi ne, %44, %c0_i32_34 : i32
    scf.if %45 {
      %c0_35 = arith.constant 0 : index
      %c0_36 = arith.constant 0 : index
      %46 = vector.load %arg10[%c0_35, %c0_36] : memref<8x1xf32, #tpu.memory_space<vmem>>, vector<8x1xf32>
      %47 = tpu.reciprocal %46 {approx = true} : vector<8x1xf32> -> vector<8x1xf32>
      %c0_37 = arith.constant 0 : index
      %c0_38 = arith.constant 0 : index
      %48 = vector.load %arg11[%c0_37, %c0_38] : memref<8x8xf32, #tpu.memory_space<vmem>>, vector<8x8xf32>
      %49 = vector.broadcast %47 : vector<8x1xf32> to vector<8x8xf32>
      %50 = arith.mulf %48, %49 : vector<8x8xf32>
      %c0_39 = arith.constant 0 : index
      %c0_40 = arith.constant 0 : index
      %c0_41 = arith.constant 0 : index
      %c0_42 = arith.constant 0 : index
      %51 = vector.load %arg8[%c0_39, %c0_40, %c0_41, %c0_42] : memref<1x1x8x8xf32, #tpu.memory_space<vmem>>, vector<1x1x8x8xf32>
      %52 = vector.shape_cast %51 : vector<1x1x8x8xf32> to vector<8x8xf32>
      %53 = vector.shape_cast %50 : vector<8x8xf32> to vector<1x1x8x8xf32>
      tpu.vector_store %arg8[%c0_39, %c0_40, %c0_41, %c0_42], %53 {strides = array<i32>} : memref<1x1x8x8xf32, #tpu.memory_space<vmem>>, vector<1x1x8x8xf32>,
    } else {
    }
    return
  }
  func.func @transform_0(%arg0: i32, %arg1: i32, %arg2: i32, %arg3: i32) -> (i32, i32, i32, i32) {
    %c0_i32 = arith.constant 0 : i32
    %c0_i32_0 = arith.constant 0 : i32
    return %arg0, %arg1, %arg2, %c0_i32 : i32, i32, i32, i32
  }
  func.func @transform_1(%arg0: i32, %arg1: i32, %arg2: i32, %arg3: i32) -> (i32, i32, i32, i32) {
    %c0_i32 = arith.constant 0 : i32
    %c0_i32_0 = arith.constant 0 : i32
    return %arg0, %arg1, %arg3, %c0_i32 : i32, i32, i32, i32
  }
  func.func @transform_2(%arg0: i32, %arg1: i32, %arg2: i32, %arg3: i32) -> (i32, i32, i32, i32) {
    %c0_i32 = arith.constant 0 : i32
    %c0_i32_0 = arith.constant 0 : i32
    return %arg0, %arg1, %arg3, %c0_i32 : i32, i32, i32, i32
  }
  func.func @transform_3(%arg0: i32, %arg1: i32, %arg2: i32, %arg3: i32) -> (i32, i32, i32) {
    %c0_i32 = arith.constant 0 : i32
    %c0_i32_0 = arith.constant 0 : i32
    return %arg0, %c0_i32, %arg3 : i32, i32, i32
  }
  func.func @transform_4(%arg0: i32, %arg1: i32, %arg2: i32, %arg3: i32) -> (i32, i32, i32, i32) {
    %c0_i32 = arith.constant 0 : i32
    %c0_i32_0 = arith.constant 0 : i32
    return %arg0, %arg1, %arg2, %c0_i32 : i32, i32, i32, i32
  }
}

module attributes {stable_mosaic.version = 11 : i64} {
  func.func @_linear_kernel(%arg0: i32, %arg1: i32, %arg2: i32, %arg3: memref<16x64xbf16, #tpu.memory_space<vmem>>, %arg4: memref<64x32xbf16, #tpu.memory_space<vmem>>, %arg5: memref<1x32xf32, #tpu.memory_space<vmem>>, %arg6: memref<16x32xf32, #tpu.memory_space<vmem>>) attributes {dimension_semantics = [#tpu.dimension_semantics<parallel>, #tpu.dimension_semantics<parallel>, #tpu.dimension_semantics<arbitrary>], iteration_bounds = array<i64: 1, 1, 1>, scalar_prefetch = 0 : i64, scratch_operands = 0 : i64, tpu.core_type = #tpu.core_type<tc>, window_params = [{transform_indices = @transform_0, window_bounds = array<i64: 16, 64>}, {transform_indices = @transform_1, window_bounds = array<i64: 64, 32>}, {transform_indices = @transform_2, window_bounds = array<i64: 1, 32>}, {transform_indices = @transform_3, window_bounds = array<i64: 16, 32>}]} {
    %c0_i32 = arith.constant 0 : i32
    %0 = arith.cmpi eq, %arg2, %c0_i32 : i32
    %1 = arith.extui %0 : i1 to i32
    %c0_i32_0 = arith.constant 0 : i32
    %2 = arith.cmpi ne, %1, %c0_i32_0 : i32
    scf.if %2 {
      %cst_10 = arith.constant 0.000000e+00 : f32
      %12 = vector.broadcast %cst_10 : f32 to vector<16x32xf32>
      %c0_11 = arith.constant 0 : index
      %c0_12 = arith.constant 0 : index
      %13 = vector.load %arg6[%c0_11, %c0_12] : memref<16x32xf32, #tpu.memory_space<vmem>>, vector<16x32xf32>
      tpu.vector_store %arg6[%c0_11, %c0_12], %12 {strides = array<i32>} : memref<16x32xf32, #tpu.memory_space<vmem>>, vector<16x32xf32>,
    } else {
    }
    %c0 = arith.constant 0 : index
    %c0_1 = arith.constant 0 : index
    %3 = vector.load %arg6[%c0, %c0_1] : memref<16x32xf32, #tpu.memory_space<vmem>>, vector<16x32xf32>
    %c0_2 = arith.constant 0 : index
    %c0_3 = arith.constant 0 : index
    %4 = vector.load %arg3[%c0_2, %c0_3] : memref<16x64xbf16, #tpu.memory_space<vmem>>, vector<16x64xbf16>
    %c0_4 = arith.constant 0 : index
    %c0_5 = arith.constant 0 : index
    %5 = vector.load %arg4[%c0_4, %c0_5] : memref<64x32xbf16, #tpu.memory_space<vmem>>, vector<64x32xbf16>
    %cst = arith.constant dense<0.000000e+00> : vector<16x32xf32>
    %6 = tpu.matmul %4, %5, %cst {dimension_numbers = #tpu.dot_dimension_numbers<[1], [0], [0], [1], [0, 0, 1, 1], [], []>} : vector<16x64xbf16>, vector<64x32xbf16>, vector<16x32xf32> -> vector<16x32xf32>
    %7 = arith.addf %3, %6 : vector<16x32xf32>
    %c0_6 = arith.constant 0 : index
    %c0_7 = arith.constant 0 : index
    %8 = vector.load %arg6[%c0_6, %c0_7] : memref<16x32xf32, #tpu.memory_space<vmem>>, vector<16x32xf32>
    tpu.vector_store %arg6[%c0_6, %c0_7], %7 {strides = array<i32>} : memref<16x32xf32, #tpu.memory_space<vmem>>, vector<16x32xf32>,
    %c0_i32_8 = arith.constant 0 : i32
    %9 = arith.cmpi eq, %arg2, %c0_i32_8 : i32
    %10 = arith.extui %9 : i1 to i32
    %c0_i32_9 = arith.constant 0 : i32
    %11 = arith.cmpi ne, %10, %c0_i32_9 : i32
    scf.if %11 {
      %c0_10 = arith.constant 0 : index
      %c0_11 = arith.constant 0 : index
      %12 = vector.load %arg6[%c0_10, %c0_11] : memref<16x32xf32, #tpu.memory_space<vmem>>, vector<16x32xf32>
      %c0_12 = arith.constant 0 : index
      %c0_13 = arith.constant 0 : index
      %13 = vector.load %arg5[%c0_12, %c0_13] : memref<1x32xf32, #tpu.memory_space<vmem>>, vector<1x32xf32>
      %14 = vector.broadcast %13 : vector<1x32xf32> to vector<16x32xf32>
      %15 = arith.addf %12, %14 : vector<16x32xf32>
      %c0_14 = arith.constant 0 : index
      %c0_15 = arith.constant 0 : index
      %16 = vector.load %arg6[%c0_14, %c0_15] : memref<16x32xf32, #tpu.memory_space<vmem>>, vector<16x32xf32>
      tpu.vector_store %arg6[%c0_14, %c0_15], %15 {strides = array<i32>} : memref<16x32xf32, #tpu.memory_space<vmem>>, vector<16x32xf32>,
    } else {
    }
    return
  }
  func.func @transform_0(%arg0: i32, %arg1: i32, %arg2: i32) -> (i32, i32) {
    %c0_i32 = arith.constant 0 : i32
    return %arg0, %arg2 : i32, i32
  }
  func.func @transform_1(%arg0: i32, %arg1: i32, %arg2: i32) -> (i32, i32) {
    %c0_i32 = arith.constant 0 : i32
    return %arg2, %arg1 : i32, i32
  }
  func.func @transform_2(%arg0: i32, %arg1: i32, %arg2: i32) -> (i32, i32) {
    %c0_i32 = arith.constant 0 : i32
    %c0_i32_0 = arith.constant 0 : i32
    return %c0_i32, %arg1 : i32, i32
  }
  func.func @transform_3(%arg0: i32, %arg1: i32, %arg2: i32) -> (i32, i32) {
    %c0_i32 = arith.constant 0 : i32
    return %arg0, %arg1 : i32, i32
  }
}

module attributes {stable_mosaic.version = 11 : i64} {
  func.func @_linear_kernel(%arg0: i32, %arg1: i32, %arg2: i32, %arg3: memref<16x32xbf16, #tpu.memory_space<vmem>>, %arg4: memref<32x64xbf16, #tpu.memory_space<vmem>>, %arg5: memref<1x64xf32, #tpu.memory_space<vmem>>, %arg6: memref<16x64xf32, #tpu.memory_space<vmem>>) attributes {dimension_semantics = [#tpu.dimension_semantics<parallel>, #tpu.dimension_semantics<parallel>, #tpu.dimension_semantics<arbitrary>], iteration_bounds = array<i64: 1, 1, 1>, scalar_prefetch = 0 : i64, scratch_operands = 0 : i64, tpu.core_type = #tpu.core_type<tc>, window_params = [{transform_indices = @transform_0, window_bounds = array<i64: 16, 32>}, {transform_indices = @transform_1, window_bounds = array<i64: 32, 64>}, {transform_indices = @transform_2, window_bounds = array<i64: 1, 64>}, {transform_indices = @transform_3, window_bounds = array<i64: 16, 64>}]} {
    %c0_i32 = arith.constant 0 : i32
    %0 = arith.cmpi eq, %arg2, %c0_i32 : i32
    %1 = arith.extui %0 : i1 to i32
    %c0_i32_0 = arith.constant 0 : i32
    %2 = arith.cmpi ne, %1, %c0_i32_0 : i32
    scf.if %2 {
      %cst_10 = arith.constant 0.000000e+00 : f32
      %12 = vector.broadcast %cst_10 : f32 to vector<16x64xf32>
      %c0_11 = arith.constant 0 : index
      %c0_12 = arith.constant 0 : index
      %13 = vector.load %arg6[%c0_11, %c0_12] : memref<16x64xf32, #tpu.memory_space<vmem>>, vector<16x64xf32>
      tpu.vector_store %arg6[%c0_11, %c0_12], %12 {strides = array<i32>} : memref<16x64xf32, #tpu.memory_space<vmem>>, vector<16x64xf32>,
    } else {
    }
    %c0 = arith.constant 0 : index
    %c0_1 = arith.constant 0 : index
    %3 = vector.load %arg6[%c0, %c0_1] : memref<16x64xf32, #tpu.memory_space<vmem>>, vector<16x64xf32>
    %c0_2 = arith.constant 0 : index
    %c0_3 = arith.constant 0 : index
    %4 = vector.load %arg3[%c0_2, %c0_3] : memref<16x32xbf16, #tpu.memory_space<vmem>>, vector<16x32xbf16>
    %c0_4 = arith.constant 0 : index
    %c0_5 = arith.constant 0 : index
    %5 = vector.load %arg4[%c0_4, %c0_5] : memref<32x64xbf16, #tpu.memory_space<vmem>>, vector<32x64xbf16>
    %cst = arith.constant dense<0.000000e+00> : vector<16x64xf32>
    %6 = tpu.matmul %4, %5, %cst {dimension_numbers = #tpu.dot_dimension_numbers<[1], [0], [0], [1], [0, 0, 1, 1], [], []>} : vector<16x32xbf16>, vector<32x64xbf16>, vector<16x64xf32> -> vector<16x64xf32>
    %7 = arith.addf %3, %6 : vector<16x64xf32>
    %c0_6 = arith.constant 0 : index
    %c0_7 = arith.constant 0 : index
    %8 = vector.load %arg6[%c0_6, %c0_7] : memref<16x64xf32, #tpu.memory_space<vmem>>, vector<16x64xf32>
    tpu.vector_store %arg6[%c0_6, %c0_7], %7 {strides = array<i32>} : memref<16x64xf32, #tpu.memory_space<vmem>>, vector<16x64xf32>,
    %c0_i32_8 = arith.constant 0 : i32
    %9 = arith.cmpi eq, %arg2, %c0_i32_8 : i32
    %10 = arith.extui %9 : i1 to i32
    %c0_i32_9 = arith.constant 0 : i32
    %11 = arith.cmpi ne, %10, %c0_i32_9 : i32
    scf.if %11 {
      %c0_10 = arith.constant 0 : index
      %c0_11 = arith.constant 0 : index
      %12 = vector.load %arg6[%c0_10, %c0_11] : memref<16x64xf32, #tpu.memory_space<vmem>>, vector<16x64xf32>
      %c0_12 = arith.constant 0 : index
      %c0_13 = arith.constant 0 : index
      %13 = vector.load %arg5[%c0_12, %c0_13] : memref<1x64xf32, #tpu.memory_space<vmem>>, vector<1x64xf32>
      %14 = vector.broadcast %13 : vector<1x64xf32> to vector<16x64xf32>
      %15 = arith.addf %12, %14 : vector<16x64xf32>
      %cst_14 = arith.constant 0.000000e+00 : f32
      %16 = vector.broadcast %cst_14 : f32 to vector<16x64xf32>
      %17 = arith.maximumf %15, %16 : vector<16x64xf32>
      %c0_15 = arith.constant 0 : index
      %c0_16 = arith.constant 0 : index
      %18 = vector.load %arg6[%c0_15, %c0_16] : memref<16x64xf32, #tpu.memory_space<vmem>>, vector<16x64xf32>
      tpu.vector_store %arg6[%c0_15, %c0_16], %17 {strides = array<i32>} : memref<16x64xf32, #tpu.memory_space<vmem>>, vector<16x64xf32>,
    } else {
    }
    return
  }
  func.func @transform_0(%arg0: i32, %arg1: i32, %arg2: i32) -> (i32, i32) {
    %c0_i32 = arith.constant 0 : i32
    return %arg0, %arg2 : i32, i32
  }
  func.func @transform_1(%arg0: i32, %arg1: i32, %arg2: i32) -> (i32, i32) {
    %c0_i32 = arith.constant 0 : i32
    return %arg2, %arg1 : i32, i32
  }
  func.func @transform_2(%arg0: i32, %arg1: i32, %arg2: i32) -> (i32, i32) {
    %c0_i32 = arith.constant 0 : i32
    %c0_i32_0 = arith.constant 0 : i32
    return %c0_i32, %arg1 : i32, i32
  }
  func.func @transform_3(%arg0: i32, %arg1: i32, %arg2: i32) -> (i32, i32) {
    %c0_i32 = arith.constant 0 : i32
    return %arg0, %arg1 : i32, i32
  }
}

module attributes {stable_mosaic.version = 11 : i64} {
  func.func @_linear_kernel(%arg0: i32, %arg1: i32, %arg2: i32, %arg3: memref<16x32xbf16, #tpu.memory_space<vmem>>, %arg4: memref<32x64xbf16, #tpu.memory_space<vmem>>, %arg5: memref<1x64xf32, #tpu.memory_space<vmem>>, %arg6: memref<16x64xf32, #tpu.memory_space<vmem>>) attributes {dimension_semantics = [#tpu.dimension_semantics<parallel>, #tpu.dimension_semantics<parallel>, #tpu.dimension_semantics<arbitrary>], iteration_bounds = array<i64: 1, 1, 1>, scalar_prefetch = 0 : i64, scratch_operands = 0 : i64, tpu.core_type = #tpu.core_type<tc>, window_params = [{transform_indices = @transform_0, window_bounds = array<i64: 16, 32>}, {transform_indices = @transform_1, window_bounds = array<i64: 32, 64>}, {transform_indices = @transform_2, window_bounds = array<i64: 1, 64>}, {transform_indices = @transform_3, window_bounds = array<i64: 16, 64>}]} {
    %c0_i32 = arith.constant 0 : i32
    %0 = arith.cmpi eq, %arg2, %c0_i32 : i32
    %1 = arith.extui %0 : i1 to i32
    %c0_i32_0 = arith.constant 0 : i32
    %2 = arith.cmpi ne, %1, %c0_i32_0 : i32
    scf.if %2 {
      %cst_10 = arith.constant 0.000000e+00 : f32
      %12 = vector.broadcast %cst_10 : f32 to vector<16x64xf32>
      %c0_11 = arith.constant 0 : index
      %c0_12 = arith.constant 0 : index
      %13 = vector.load %arg6[%c0_11, %c0_12] : memref<16x64xf32, #tpu.memory_space<vmem>>, vector<16x64xf32>
      tpu.vector_store %arg6[%c0_11, %c0_12], %12 {strides = array<i32>} : memref<16x64xf32, #tpu.memory_space<vmem>>, vector<16x64xf32>,
    } else {
    }
    %c0 = arith.constant 0 : index
    %c0_1 = arith.constant 0 : index
    %3 = vector.load %arg6[%c0, %c0_1] : memref<16x64xf32, #tpu.memory_space<vmem>>, vector<16x64xf32>
    %c0_2 = arith.constant 0 : index
    %c0_3 = arith.constant 0 : index
    %4 = vector.load %arg3[%c0_2, %c0_3] : memref<16x32xbf16, #tpu.memory_space<vmem>>, vector<16x32xbf16>
    %c0_4 = arith.constant 0 : index
    %c0_5 = arith.constant 0 : index
    %5 = vector.load %arg4[%c0_4, %c0_5] : memref<32x64xbf16, #tpu.memory_space<vmem>>, vector<32x64xbf16>
    %cst = arith.constant dense<0.000000e+00> : vector<16x64xf32>
    %6 = tpu.matmul %4, %5, %cst {dimension_numbers = #tpu.dot_dimension_numbers<[1], [0], [0], [1], [0, 0, 1, 1], [], []>} : vector<16x32xbf16>, vector<32x64xbf16>, vector<16x64xf32> -> vector<16x64xf32>
    %7 = arith.addf %3, %6 : vector<16x64xf32>
    %c0_6 = arith.constant 0 : index
    %c0_7 = arith.constant 0 : index
    %8 = vector.load %arg6[%c0_6, %c0_7] : memref<16x64xf32, #tpu.memory_space<vmem>>, vector<16x64xf32>
    tpu.vector_store %arg6[%c0_6, %c0_7], %7 {strides = array<i32>} : memref<16x64xf32, #tpu.memory_space<vmem>>, vector<16x64xf32>,
    %c0_i32_8 = arith.constant 0 : i32
    %9 = arith.cmpi eq, %arg2, %c0_i32_8 : i32
    %10 = arith.extui %9 : i1 to i32
    %c0_i32_9 = arith.constant 0 : i32
    %11 = arith.cmpi ne, %10, %c0_i32_9 : i32
    scf.if %11 {
      %c0_10 = arith.constant 0 : index
      %c0_11 = arith.constant 0 : index
      %12 = vector.load %arg6[%c0_10, %c0_11] : memref<16x64xf32, #tpu.memory_space<vmem>>, vector<16x64xf32>
      %c0_12 = arith.constant 0 : index
      %c0_13 = arith.constant 0 : index
      %13 = vector.load %arg5[%c0_12, %c0_13] : memref<1x64xf32, #tpu.memory_space<vmem>>, vector<1x64xf32>
      %14 = vector.broadcast %13 : vector<1x64xf32> to vector<16x64xf32>
      %15 = arith.addf %12, %14 : vector<16x64xf32>
      %c0_14 = arith.constant 0 : index
      %c0_15 = arith.constant 0 : index
      %16 = vector.load %arg6[%c0_14, %c0_15] : memref<16x64xf32, #tpu.memory_space<vmem>>, vector<16x64xf32>
      tpu.vector_store %arg6[%c0_14, %c0_15], %15 {strides = array<i32>} : memref<16x64xf32, #tpu.memory_space<vmem>>, vector<16x64xf32>,
    } else {
    }
    return
  }
  func.func @transform_0(%arg0: i32, %arg1: i32, %arg2: i32) -> (i32, i32) {
    %c0_i32 = arith.constant 0 : i32
    return %arg0, %arg2 : i32, i32
  }
  func.func @transform_1(%arg0: i32, %arg1: i32, %arg2: i32) -> (i32, i32) {
    %c0_i32 = arith.constant 0 : i32
    return %arg2, %arg1 : i32, i32
  }
  func.func @transform_2(%arg0: i32, %arg1: i32, %arg2: i32) -> (i32, i32) {
    %c0_i32 = arith.constant 0 : i32
    %c0_i32_0 = arith.constant 0 : i32
    return %c0_i32, %arg1 : i32, i32
  }
  func.func @transform_3(%arg0: i32, %arg1: i32, %arg2: i32) -> (i32, i32) {
    %c0_i32 = arith.constant 0 : i32
    return %arg0, %arg1 : i32, i32
  }
}

module attributes {stable_mosaic.version = 11 : i64} {
  func.func @_linear_kernel(%arg0: i32, %arg1: i32, %arg2: i32, %arg3: memref<16x32xbf16, #tpu.memory_space<vmem>>, %arg4: memref<32x16xbf16, #tpu.memory_space<vmem>>, %arg5: memref<1x16xf32, #tpu.memory_space<vmem>>, %arg6: memref<16x16xf32, #tpu.memory_space<vmem>>) attributes {dimension_semantics = [#tpu.dimension_semantics<parallel>, #tpu.dimension_semantics<parallel>, #tpu.dimension_semantics<arbitrary>], iteration_bounds = array<i64: 1, 1, 1>, scalar_prefetch = 0 : i64, scratch_operands = 0 : i64, tpu.core_type = #tpu.core_type<tc>, window_params = [{transform_indices = @transform_0, window_bounds = array<i64: 16, 32>}, {transform_indices = @transform_1, window_bounds = array<i64: 32, 16>}, {transform_indices = @transform_2, window_bounds = array<i64: 1, 16>}, {transform_indices = @transform_3, window_bounds = array<i64: 16, 16>}]} {
    %c0_i32 = arith.constant 0 : i32
    %0 = arith.cmpi eq, %arg2, %c0_i32 : i32
    %1 = arith.extui %0 : i1 to i32
    %c0_i32_0 = arith.constant 0 : i32
    %2 = arith.cmpi ne, %1, %c0_i32_0 : i32
    scf.if %2 {
      %cst_10 = arith.constant 0.000000e+00 : f32
      %12 = vector.broadcast %cst_10 : f32 to vector<16x16xf32>
      %c0_11 = arith.constant 0 : index
      %c0_12 = arith.constant 0 : index
      %13 = vector.load %arg6[%c0_11, %c0_12] : memref<16x16xf32, #tpu.memory_space<vmem>>, vector<16x16xf32>
      tpu.vector_store %arg6[%c0_11, %c0_12], %12 {strides = array<i32>} : memref<16x16xf32, #tpu.memory_space<vmem>>, vector<16x16xf32>,
    } else {
    }
    %c0 = arith.constant 0 : index
    %c0_1 = arith.constant 0 : index
    %3 = vector.load %arg6[%c0, %c0_1] : memref<16x16xf32, #tpu.memory_space<vmem>>, vector<16x16xf32>
    %c0_2 = arith.constant 0 : index
    %c0_3 = arith.constant 0 : index
    %4 = vector.load %arg3[%c0_2, %c0_3] : memref<16x32xbf16, #tpu.memory_space<vmem>>, vector<16x32xbf16>
    %c0_4 = arith.constant 0 : index
    %c0_5 = arith.constant 0 : index
    %5 = vector.load %arg4[%c0_4, %c0_5] : memref<32x16xbf16, #tpu.memory_space<vmem>>, vector<32x16xbf16>
    %cst = arith.constant dense<0.000000e+00> : vector<16x16xf32>
    %6 = tpu.matmul %4, %5, %cst {dimension_numbers = #tpu.dot_dimension_numbers<[1], [0], [0], [1], [0, 0, 1, 1], [], []>} : vector<16x32xbf16>, vector<32x16xbf16>, vector<16x16xf32> -> vector<16x16xf32>
    %7 = arith.addf %3, %6 : vector<16x16xf32>
    %c0_6 = arith.constant 0 : index
    %c0_7 = arith.constant 0 : index
    %8 = vector.load %arg6[%c0_6, %c0_7] : memref<16x16xf32, #tpu.memory_space<vmem>>, vector<16x16xf32>
    tpu.vector_store %arg6[%c0_6, %c0_7], %7 {strides = array<i32>} : memref<16x16xf32, #tpu.memory_space<vmem>>, vector<16x16xf32>,
    %c0_i32_8 = arith.constant 0 : i32
    %9 = arith.cmpi eq, %arg2, %c0_i32_8 : i32
    %10 = arith.extui %9 : i1 to i32
    %c0_i32_9 = arith.constant 0 : i32
    %11 = arith.cmpi ne, %10, %c0_i32_9 : i32
    scf.if %11 {
      %c0_10 = arith.constant 0 : index
      %c0_11 = arith.constant 0 : index
      %12 = vector.load %arg6[%c0_10, %c0_11] : memref<16x16xf32, #tpu.memory_space<vmem>>, vector<16x16xf32>
      %c0_12 = arith.constant 0 : index
      %c0_13 = arith.constant 0 : index
      %13 = vector.load %arg5[%c0_12, %c0_13] : memref<1x16xf32, #tpu.memory_space<vmem>>, vector<1x16xf32>
      %14 = vector.broadcast %13 : vector<1x16xf32> to vector<16x16xf32>
      %15 = arith.addf %12, %14 : vector<16x16xf32>
      %c0_14 = arith.constant 0 : index
      %c0_15 = arith.constant 0 : index
      %16 = vector.load %arg6[%c0_14, %c0_15] : memref<16x16xf32, #tpu.memory_space<vmem>>, vector<16x16xf32>
      tpu.vector_store %arg6[%c0_14, %c0_15], %15 {strides = array<i32>} : memref<16x16xf32, #tpu.memory_space<vmem>>, vector<16x16xf32>,
    } else {
    }
    return
  }
  func.func @transform_0(%arg0: i32, %arg1: i32, %arg2: i32) -> (i32, i32) {
    %c0_i32 = arith.constant 0 : i32
    return %arg0, %arg2 : i32, i32
  }
  func.func @transform_1(%arg0: i32, %arg1: i32, %arg2: i32) -> (i32, i32) {
    %c0_i32 = arith.constant 0 : i32
    return %arg2, %arg1 : i32, i32
  }
  func.func @transform_2(%arg0: i32, %arg1: i32, %arg2: i32) -> (i32, i32) {
    %c0_i32 = arith.constant 0 : i32
    %c0_i32_0 = arith.constant 0 : i32
    return %c0_i32, %arg1 : i32, i32
  }
  func.func @transform_3(%arg0: i32, %arg1: i32, %arg2: i32) -> (i32, i32) {
    %c0_i32 = arith.constant 0 : i32
    return %arg0, %arg1 : i32, i32
  }
}

</mosaic_0001>

<bundles_post_ra>
// kernel: transformer_forward.27
= control target key start
LH: loop header
LB: loop body
LE: loop exit
PB: predicated region body
PF: predicated region fallthrough
CT: control target
= control target key end

     0   :  { %vm19_vm0 = vcmask 785408   ;;  %v138_v0 = vmov 0.0   ;;  %vm139_vm1 = vmmov 0   ;;  %vm47_vm2 = vcmask 261120   ;;  %s208_s3 = inlined_call_operand.vmem [shape: f32[16,96], index: 3, kind: output, shape index: {}]   ;;  %s209_s1 = inlined_call_operand.vmem [shape: bf16[32,96], index: 1, kind: input, shape index: {}]   ;;  %s210_s0 = inlined_call_operand.vmem [shape: bf16[16,32], index: 0, kind: input, shape index: {}]   ;;  %s211_s2 = inlined_call_operand.vmem [shape: f32[1,96], index: 2, kind: input, shape index: {}]  }
   0x1   :  { %20 = vst.msk [vmem:[%s208_s3] sm:$0xff] %vm19_vm0, %v138_v0  ;;  %21 = vst.msk [vmem:[%s208_s3 + $0x8] sm:$0xff] %vm19_vm0, %v138_v0  ;;  %125 = vmatprep.subr.bf16.mxu0 %v138_v0  ;;  %v135_v1 = vld [vmem:[%s209_s1] sm:$0xff]   ;;  %129 = vmatprep.mubr.msk.bf16.mxu0 %vm139_vm1, %v138_v0  ;;  %v136_v2 = vld [vmem:[%s209_s1 + $0x8] sm:$0xff]  }
   0x2   :  { %126 = vmatpush3.bf16.msra.mxu0 %v135_v1  ;;  %v137_v3 = vld [vmem:[%s210_s0] sm:$0xff]  }
   0x3   :  { %127 = vmatprep.subr.bf16.mxu0 %v138_v0  ;;  %v121_v12 = vld [vmem:[%s211_s2] ss:$0 sm:$0xff] }
   0x6   :  { %128 = vmatpush3.bf16.msra.mxu0 %v136_v2 }
   0x8   :  { %v22_v4 = vld [vmem:[%s208_s3] sm:$0xff]  ;;  %v23_v6 = vld [vmem:[%s208_s3 + $0x8] sm:$0xff] }
   0x9   :  { %130 = vmatmul.mubr.msk.bf16.vlgmr.msra.gmra.mrb[0].mxu0 %vm47_vm2, %v137_v3 }
  0xdc   :  { %v85_v5 = vpop.f32.mrb[0].mxu0 }
  0xdd   :  { %v92_v7 = vadd.f32 %v85_v5, %v22_v4  ;;  %v131_v8 = vpop.f32.mrb[1].mxu0 }
  0xde   :  { %v88_v9 = vpop.f32.mrb[2].mxu0 }
  0xdf   :  { %95 = vst.msk [vmem:[%s208_s3] sm:$0xff] %vm19_vm0, %v92_v7  ;;  %v93_v10 = vadd.f32 %v88_v9, %v23_v6  ;;  %v132_v11 = vpop.f32.mrb[3].mxu0 }
  0xe1   :  { %96 = vst.msk [vmem:[%s208_s3 + $0x8] sm:$0xff] %vm19_vm0, %v93_v10 }
  0xe6   :  { %v100_v13 = vld [vmem:[%s208_s3] sm:$0xff] }
  0xe7   :  { %v109_v14 = vadd.f32 %v121_v12, %v100_v13 }
  0xe8   :  { %v101_v15 = vld [vmem:[%s208_s3 + $0x8] sm:$0xff] }
  0xe9   :  { %111 = vst.msk [vmem:[%s208_s3] sm:$0xff] %vm19_vm0, %v109_v14  ;;  %v110_v16 = vadd.f32 %v121_v12, %v101_v15 }
  0xeb   :  { %112 = vst.msk [vmem:[%s208_s3 + $0x8] sm:$0xff] %vm19_vm0, %v110_v16 }

// kernel: transformer_forward.29
= control target key start
LH: loop header
LB: loop body
LE: loop exit
PB: predicated region body
PF: predicated region fallthrough
CT: control target
= control target key end

     0   :  { %vm19_vm0 = vcmask 261120   ;;  %v137_v0 = vmov 0.0   ;;  %vm138_vm1 = vmmov 0   ;;  %s208_s1 = inlined_call_operand.vmem [shape: bf16[32,32], index: 1, kind: input, shape index: {}]   ;;  %s209_s3 = inlined_call_operand.vmem [shape: f32[16,32], index: 3, kind: output, shape index: {}]   ;;  %s210_s0 = inlined_call_operand.vmem [shape: bf16[16,32], index: 0, kind: input, shape index: {}]   ;;  %s211_s2 = inlined_call_operand.vmem [shape: f32[1,32], index: 2, kind: input, shape index: {}]  }
   0x1   :  { %124 = vmatprep.subr.bf16.mxu0 %v137_v0  ;;  %v134_v1 = vld [vmem:[%s208_s1] sm:$0xff]   ;;  %128 = vmatprep.mubr.msk.bf16.mxu0 %vm138_vm1, %v137_v0  ;;  %20 = vst.msk [vmem:[%s209_s3] sm:$0xff] %vm19_vm0, %v137_v0  ;;  %21 = vst.msk [vmem:[%s209_s3 + $0x8] sm:$0xff] %vm19_vm0, %v137_v0  ;;  %v135_v2 = vld [vmem:[%s208_s1 + $0x8] sm:$0xff]  }
   0x2   :  { %125 = vmatpush3.bf16.msra.mxu0 %v134_v1  ;;  %v136_v3 = vld [vmem:[%s210_s0] sm:$0xff]  }
   0x3   :  { %126 = vmatprep.subr.bf16.mxu0 %v137_v0  ;;  %v120_v12 = vld [vmem:[%s211_s2] ss:$0 sm:$0xff] }
   0x6   :  { %127 = vmatpush3.bf16.msra.mxu0 %v135_v2 }
   0x8   :  { %v22_v4 = vld [vmem:[%s209_s3] sm:$0xff]  ;;  %v23_v6 = vld [vmem:[%s209_s3 + $0x8] sm:$0xff] }
   0x9   :  { %129 = vmatmul.mubr.msk.bf16.vlgmr.msra.gmra.mrb[0].mxu0 %vm19_vm0, %v136_v3 }
  0xdc   :  { %v85_v5 = vpop.f32.mrb[0].mxu0 }
  0xdd   :  { %v92_v7 = vadd.f32 %v85_v5, %v22_v4  ;;  %v130_v8 = vpop.f32.mrb[1].mxu0 }
  0xde   :  { %v88_v9 = vpop.f32.mrb[2].mxu0 }
  0xdf   :  { %94 = vst.msk [vmem:[%s209_s3] sm:$0xff] %vm19_vm0, %v92_v7  ;;  %v93_v10 = vadd.f32 %v88_v9, %v23_v6  ;;  %v131_v11 = vpop.f32.mrb[3].mxu0 }
  0xe1   :  { %95 = vst.msk [vmem:[%s209_s3 + $0x8] sm:$0xff] %vm19_vm0, %v93_v10 }
  0xe6   :  { %v99_v13 = vld [vmem:[%s209_s3] sm:$0xff] }
  0xe7   :  { %v108_v14 = vadd.f32 %v120_v12, %v99_v13 }
  0xe8   :  { %v100_v15 = vld [vmem:[%s209_s3 + $0x8] sm:$0xff] }
  0xe9   :  { %110 = vst.msk [vmem:[%s209_s3] sm:$0xff] %vm19_vm0, %v108_v14  ;;  %v109_v16 = vadd.f32 %v120_v12, %v100_v15 }
  0xeb   :  { %111 = vst.msk [vmem:[%s209_s3 + $0x8] sm:$0xff] %vm19_vm0, %v109_v16 }

// kernel: transformer_forward.28
= control target key start
LH: loop header
LB: loop body
LE: loop exit
PB: predicated region body
PF: predicated region fallthrough
CT: control target
= control target key end

     0   :  { %s857_s15 = smov 0   ;;  %s859_s16 = smov 0   ;;  %s938_s0 = inlined_call_operand.vmem [shape: bf16[2,4,8,8], index: 0, kind: input, shape index: {}]   ;;  %s939_s1 = inlined_call_operand.vmem [shape: bf16[2,4,8,8], index: 1, kind: input, shape index: {}]   ;;  %s940_s2 = inlined_call_operand.vmem [shape: bf16[2,4,8,8], index: 2, kind: input, shape index: {}]   ;;  %s941_s3 = inlined_call_operand.vmem [shape: f32[2,8,1], index: 3, kind: input, shape index: {}]   ;;  %s942_s4 = inlined_call_operand.vmem [shape: f32[2,4,8,8], index: 4, kind: output, shape index: {}]  }
   0x1   :  { %s861_s17 = smov 0   ;;  %s863_s18 = smov 0  }
   0x2   :  { %s865_s19 = smov 0  }
   0x3 LB: > { %s36_s20 = sadd.s32 1, %s818_s17  ;;  %s40_s21 = sadd.s32 1, %s822_s18  ;;  %s826_s19 = sphi %s865_s19, %s14_s19   ;;  %s822_s18 = sphi %s863_s18, %s946_s18   ;;  %s818_s17 = sphi %s861_s17, %s945_s17   ;;  %s814_s16 = sphi %s859_s16, %s944_s16   ;;  %s810_s15 = sphi %s857_s15, %s943_s15  }
   0x4   : > { %p38_p0 = scmp.ge.s32.totalorder %s36_s20, 4  ;;  %p705_p1 = scmp.ge.s32.totalorder %s826_s19, 1 }
   0x5   : > { %p256_p2 = scmp.lt.s32.totalorder %s826_s19, 9 }
   0x6   : > { %s948_s20 = smov (%p38_p0, %s36_s20), 0  ;;  %s950_s21 = smov (!%p38_p0, %s40_s21), %s822_s18 }
   0x7   : > { %p257_p3 = pnand %p705_p1, %p256_p2  ;;  %p42_p4 = scmp.ge.s32.totalorder %s950_s21, 2 }
   0x8   : > { %p323_p5 = scmp.lt.s32.totalorder (!%p257_p3), %s814_s16, 1  ;;  %p325_p6 = scmp.lt.s32.totalorder (!%p257_p3), %s810_s15, 3  ;;  %vm382_vm0 = vcmask (!%p257_p3), 64512   ;;  %v828_v0 = vmov (!%p257_p3), 0.0   ;;  %vm829_vm1 = vmmov (!%p257_p3), 0   ;;  %v830_v1 = vmov (!%p257_p3), 0  }
   0x9   : > { %s952_s21 = smov (%p42_p4, %s950_s21), 0  ;;  %260 = sbr.rel (%p257_p3) target bundleno = 829 (0x33d), region = 36 }
   0xa   : > { %724 = vmatprep.subr.bf16.mxu0 (!%p257_p3), %v828_v0  ;;  %383 = vst.msk [vmem:[#allocation4] sm:$0xff] (!%p257_p3), %vm382_vm0, %v828_v0  ;;  %726 = vmatprep.mubr.msk.bf16.mxu0 (!%p257_p3), %vm829_vm1, %v828_v0  ;;  %vm379_vm2 = vcmask (!%p257_p3), 7168   ;;  %v831_v8 = vmov (!%p257_p3), -1e+30   ;;  %vm479_vm3 = vcmask (!%p257_p3), 1043456  }
   0xb   : > { %780 = vset.pattern.permute.xlu0 (!%p257_p3), %v830_v1  ;;  %781 = vset.pattern.permute.xlu1 (!%p257_p3), %v830_v1  ;;  %380 = vst.msk [vmem:[#allocation2] sm:$0xff] (!%p257_p3), %vm379_vm2, %v831_v8  ;;  %381 = vst.msk [vmem:[#allocation3] sm:$0xff] (!%p257_p3), %vm379_vm2, %v828_v0 }
   0xc   : > { %730 = vmatprep.subr.bf16.mxu1 (!%p257_p3), %v828_v0  ;;  %732 = vmatprep.mubr.msk.bf16.mxu1 (!%p257_p3), %vm829_vm1, %v828_v0 }
  0x10   : > { %s954_s16 = smov (!%p323_p5, %s814_s16), 1  ;;  %s956_s15 = smov (!%p325_p6, %s810_s15), 3 }
  0x11   : > { %s706_s22 = sshll.u32 %s954_s16, 2  ;;  %s712_s23 = sshll.u32 %s954_s16, 3  ;;  %v468_v37 = vld [vmem:[#allocation4] sm:$0xff] }
  0x12   : > { %s888_s24 = sadd.s32 %s706_s22, %s956_s15  ;;  %s362_s27 = scalar_lea.vmem %s941_s3, %s712_s23  ;;  %v444_v17 = vld [vmem:[#allocation2] sm:$0xff]  ;;  %v460_v31 = vld [vmem:[#allocation3] sm:$0xff] }
  0x13   : > { %s894_s28 = sshll.u32 %s888_s24, 2  ;;  %v435_v2 = vld [vmem:[%s362_s27] sm:$0xff]  ;;  %s714_s12 = sshll.u32 %s888_s24, 3 }
  0x14   : > { %s344_s5 = scalar_lea.vmem %s939_s1, %s894_s28  ;;  %v716_v3 = vadd.f32 -1.0, %v435_v2  ;;  %s333_s8 = scalar_lea.vmem %s938_s0, %s894_s28 }
  0x15   : > { %v385_v4 = vld [vmem:[%s344_s5] sm:$0xf]  ;;  %s355_s11 = scalar_lea.vmem %s940_s2, %s894_s28  ;;  %s373_s15 = scalar_lea.vmem %s942_s4, %s714_s12 }
  0x16   : > { %v392_v5 = vsel %vm382_vm0, %v385_v4, 0  ;;  %v437_v6 = vmul.f32 1e+09, %v716_v3  ;;  %v384_v7 = vld [vmem:[%s333_s8] sm:$0xf] }
  0x17   : > { %725 = vmatpush3.bf16.xpose.msra.mxu0 %v392_v5  ;;  %v386_v22 = vld [vmem:[%s355_s11] sm:$0xf] }
  0x18   : > { %440 = vperm.xlu0 %780, %v437_v6   ;;  %v481_v23 = vsel %vm479_vm3, %v386_v22, 0 }
  0x19   : > { %731 = vmatpush3.bf16.msra.mxu1 %v481_v23 }
  0x1e   : > { %727 = vmatmul.mubr.msk.bf16.vlgmr.msra.gmra.mrb[0].mxu0 %vm382_vm0, %v384_v7 }
  0x97   : > { %v441_v10 = vpop.permute.xlu0 %440 }
  0xf1   : > { %v428_v9 = vpop.f32.mrb[0].mxu0 }
  0xf2   : > { %v434_v11 = vmul.f32 0.35355338, %v428_v9  ;;  %v728_v12 = vpop.f32.mrb[1].mxu0 }
  0xf3   : > { %v431_v13 = vpop.f32.mrb[2].mxu0 }
  0xf4   : > { %v443_v14 = vadd.f32 %v441_v10, %v434_v11  ;;  %v729_v15 = vpop.f32.mrb[3].mxu0 }
  0xf6   : > { %v445_v16 = vsel %vm382_vm0, %v443_v14, -inf }
  0xf7   : > { %446 = vmax.xlane.f32.xlu0 %v445_v16 }
 0x184   : > { %v447_v18 = vpop.xlane.xlu0 %446 }
 0x185   : > { %v448_v19 = vmax.f32 %v444_v17, %v447_v18 }
 0x187   : > { %v449_v20 = vsub.f32 %v444_v17, %v448_v19  ;;  %525 = vst.msk [vmem:[#allocation2] sm:$0xff] %vm379_vm2, %v448_v19  ;;  %454 = vperm.xlu1 %781, %v448_v19  }
 0x189   : > { %v450_v21 = vmul.f32 1.442695, %v449_v20 }
 0x18b   : > { %782 = vpow2.f32 %v450_v21 }
 0x195   : > { %v783_v24 = vpop.eup %782 }
 0x196   : > { %471 = vperm.xlu0 %780, %v783_v24   ;;  %v461_v32 = vmul.f32 %v783_v24, %v460_v31 }
 0x206   : > { %v455_v25 = vpop.permute.xlu1 %454 }
 0x207   : > { %v457_v26 = vsub.f32 %v443_v14, %v455_v25 }
 0x209   : > { %v458_v27 = vmul.f32 1.442695, %v457_v26 }
 0x20b   : > { %784 = vpow2.f32 %v458_v27 }
 0x215   : > { %v785_v28 = vpop.eup %784  ;;  %v472_v38 = vpop.permute.xlu0 %471 }
 0x216   : > { %v462_v29 = vsel %vm382_vm0, %v785_v28, 0.0  ;;  %v475_v30 = vpack.c.bf16 %v785_v28, %v785_v28  ;;  %v474_v39 = vmul.f32 %v472_v38, %v468_v37 }
 0x217   : > { %463 = vadd.xlane.f32.xlu1 %v462_v29 }
 0x218   : > { %733 = vmatmul.mubr.msk.bf16.vlgmr.msra.gmra.mrb[0].mxu1 %vm382_vm0, %v475_v30 }
 0x2a4   : > { %v464_v33 = vpop.xlane.xlu1 %463 }
 0x2a5   : > { %v465_v34 = vadd.f32 %v464_v33, %v461_v32 }
 0x2a7   : > { %467 = vst.msk [vmem:[#allocation3] sm:$0xff] %vm379_vm2, %v465_v34 }
 0x2ae   : > { %v529_v35 = vld [vmem:[#allocation3] sm:$0xff] }
 0x2af   : > { %786 = vrcp.f32 %v529_v35 }
 0x2b9   : > { %v787_v36 = vpop.eup %786 }
 0x2ba   : > { %534 = vperm.xlu1 %781, %v787_v36  }
 0x2eb   : > { %v517_v40 = vpop.f32.mrb[0].mxu1 }
 0x2ec   : > { %v523_v41 = vadd.f32 %v517_v40, %v474_v39  ;;  %v734_v42 = vpop.f32.mrb[1].mxu1 }
 0x2ed   : > { %v520_v43 = vpop.f32.mrb[2].mxu1 }
 0x2ee   : > { %524 = vst.msk [vmem:[#allocation4] sm:$0xff] %vm382_vm0, %v523_v41  ;;  %v735_v44 = vpop.f32.mrb[3].mxu1 }
 0x2f5   : > { %v531_v45 = vld [vmem:[#allocation4] sm:$0xff] }
 0x339   : > { %v535_v46 = vpop.permute.xlu1 %534 }
 0x33a   : > { %v537_v47 = vmul.f32 %v535_v46, %v531_v45 }
 0x33c   : > { %538 = vst.msk [vmem:[%s373_s15] sm:$0xff] %vm382_vm0, %v537_v47 }
 0x33d PF: > { %s14_s19 = sadd.s32 1, %s826_s19   ;;  %s943_s15 = smov %s818_s17 }
 0x33e   : > { %p11_p7 = scmp.ge.s32.totalorder %s14_s19, 10   ;;  %s944_s16 = smov %s822_s18 }
 0x33f   : > { %s945_s17 = smov %s948_s20  ;;  %s946_s18 = smov %s952_s21 }
 0x340   :  { %13 = sbr.rel (!%p11_p7) target bundleno = 3 (0x3), region = 83 }

// kernel: transformer_forward.30
= control target key start
LH: loop header
LB: loop body
LE: loop exit
PB: predicated region body
PF: predicated region fallthrough
CT: control target
= control target key end

     0   :  { %vm23_vm0 = vcmask 261120   ;;  %s136_s0 = inlined_call_operand.vmem [shape: f32[16,32], index: 0, kind: input, shape index: {}]   ;;  %s137_s1 = inlined_call_operand.vmem [shape: f32[16,32], index: 1, kind: input, shape index: {}]   ;;  %s138_s2 = inlined_call_operand.vmem [shape: f32[1,32], index: 2, kind: input, shape index: {}]   ;;  %s139_s3 = inlined_call_operand.vmem [shape: f32[1,32], index: 3, kind: input, shape index: {}]   ;;  %s140_s4 = inlined_call_operand.vmem [shape: f32[16,32], index: 4, kind: output, shape index: {}]  }
   0x1   :  { %v17_v0 = vld [vmem:[%s136_s0] sm:$0xff]  ;;  %v18_v2 = vld [vmem:[%s136_s0 + $0x8] sm:$0xff] }
   0x2   :  { %v19_v1 = vld [vmem:[%s137_s1] sm:$0xff]  ;;  %v20_v4 = vld [vmem:[%s137_s1 + $0x8] sm:$0xff] }
   0x3   :  { %v21_v3 = vadd.f32 %v19_v1, %v17_v0  ;;  %v22_v5 = vadd.f32 %v20_v4, %v18_v2  ;;  %v75_v25 = vld [vmem:[%s138_s2] ss:$0 sm:$0xff] }
   0x4   :  { %v76_v27 = vld [vmem:[%s139_s3] ss:$0 sm:$0xff] }
   0x5   :  { %v24_v6 = vsel %vm23_vm0, %v21_v3, 0.0  ;;  %v27_v7 = vsel %vm23_vm0, %v22_v5, 0.0 }
   0x6   :  { %25 = vadd.xlane.f32.xlu0 %v24_v6 }
   0xa   :  { %28 = vadd.xlane.f32.xlu0 %v27_v7 }
  0x93   :  { %v26_v8 = vpop.xlane.xlu0 %25 }
  0x94   :  { %v31_v9 = vmul.f32 0.03125, %v26_v8 }
  0x96   :  { %v33_v10 = vsub.f32 %v21_v3, %v31_v9 }
  0x97   :  { %v29_v11 = vpop.xlane.xlu0 %28 }
  0x98   :  { %v32_v12 = vmul.f32 0.03125, %v29_v11  ;;  %v35_v13 = vmul.f32 %v33_v10, %v33_v10 }
  0x9a   :  { %v34_v14 = vsub.f32 %v22_v5, %v32_v12  ;;  %v37_v15 = vsel %vm23_vm0, %v35_v13, 0.0 }
  0x9b   :  { %38 = vadd.xlane.f32.xlu1 %v37_v15 }
  0x9c   :  { %v36_v16 = vmul.f32 %v34_v14, %v34_v14 }
  0x9e   :  { %v40_v17 = vsel %vm23_vm0, %v36_v16, 0.0 }
  0x9f   :  { %41 = vadd.xlane.f32.xlu1 %v40_v17 }
 0x128   :  { %v39_v18 = vpop.xlane.xlu1 %38 }
 0x129   :  { %v43_v19 = vmul.f32 0.03125, %v39_v18 }
 0x12b   :  { %v45_v20 = vadd.f32 1e-05, %v43_v19 }
 0x12c   :  { %v42_v21 = vpop.xlane.xlu1 %41 }
 0x12d   :  { %77 = vrsqrt.f32 %v45_v20  ;;  %v44_v22 = vmul.f32 0.03125, %v42_v21 }
 0x12f   :  { %v46_v23 = vadd.f32 1e-05, %v44_v22 }
 0x131   :  { %79 = vrsqrt.f32 %v46_v23 }
 0x137   :  { %v78_v24 = vpop.eup %77 }
 0x138   :  { %v49_v26 = vmul.f32 %v78_v24, %v33_v10 }
 0x13a   :  { %v58_v28 = vmul.f32 %v75_v25, %v49_v26 }
 0x13b   :  { %v80_v29 = vpop.eup %79 }
 0x13c   :  { %v67_v30 = vadd.f32 %v76_v27, %v58_v28  ;;  %v50_v31 = vmul.f32 %v80_v29, %v34_v14 }
 0x13e   :  { %69 = vst.msk [vmem:[%s140_s4] sm:$0xff] %vm23_vm0, %v67_v30  ;;  %v59_v32 = vmul.f32 %v75_v25, %v50_v31 }
 0x140   :  { %v68_v33 = vadd.f32 %v76_v27, %v59_v32 }
 0x142   :  { %70 = vst.msk [vmem:[%s140_s4 + $0x8] sm:$0xff] %vm23_vm0, %v68_v33 }

// kernel: transformer_forward.21
= control target key start
LH: loop header
LB: loop body
LE: loop exit
PB: predicated region body
PF: predicated region fallthrough
CT: control target
= control target key end

     0   :  { %s851_s15 = smov 0   ;;  %s853_s16 = smov 0   ;;  %s932_s0 = inlined_call_operand.vmem [shape: bf16[2,4,8,8], index: 0, kind: input, shape index: {}]   ;;  %s933_s1 = inlined_call_operand.vmem [shape: bf16[2,4,8,8], index: 1, kind: input, shape index: {}]   ;;  %s934_s2 = inlined_call_operand.vmem [shape: bf16[2,4,8,8], index: 2, kind: input, shape index: {}]   ;;  %s935_s3 = inlined_call_operand.vmem [shape: f32[2,1,8], index: 3, kind: input, shape index: {}]   ;;  %s936_s4 = inlined_call_operand.vmem [shape: f32[2,4,8,8], index: 4, kind: output, shape index: {}]  }
   0x1   :  { %s855_s17 = smov 0   ;;  %s857_s18 = smov 0  }
   0x2   :  { %s859_s19 = smov 0  }
   0x3 LB: > { %s36_s20 = sadd.s32 1, %s812_s17  ;;  %s40_s21 = sadd.s32 1, %s816_s18  ;;  %s820_s19 = sphi %s859_s19, %s14_s19   ;;  %s816_s18 = sphi %s857_s18, %s940_s18   ;;  %s812_s17 = sphi %s855_s17, %s939_s17   ;;  %s808_s16 = sphi %s853_s16, %s938_s16   ;;  %s804_s15 = sphi %s851_s15, %s937_s15  }
   0x4   : > { %p38_p0 = scmp.ge.s32.totalorder %s36_s20, 4  ;;  %p700_p1 = scmp.ge.s32.totalorder %s820_s19, 1 }
   0x5   : > { %p255_p2 = scmp.lt.s32.totalorder %s820_s19, 9 }
   0x6   : > { %s942_s20 = smov (%p38_p0, %s36_s20), 0  ;;  %s944_s21 = smov (!%p38_p0, %s40_s21), %s816_s18 }
   0x7   : > { %p256_p3 = pnand %p700_p1, %p255_p2  ;;  %p42_p4 = scmp.ge.s32.totalorder %s944_s21, 2 }
   0x8   : > { %p321_p5 = scmp.lt.s32.totalorder (!%p256_p3), %s808_s16, 1  ;;  %p323_p6 = scmp.lt.s32.totalorder (!%p256_p3), %s804_s15, 3  ;;  %vm379_vm0 = vcmask (!%p256_p3), 64512   ;;  %v822_v0 = vmov (!%p256_p3), 0.0   ;;  %vm823_vm1 = vmmov (!%p256_p3), 0   ;;  %vm376_vm2 = vcmask (!%p256_p3), 7168  }
   0x9   : > { %s946_s21 = smov (%p42_p4, %s944_s21), 0  ;;  %259 = sbr.rel (%p256_p3) target bundleno = 829 (0x33d), region = 36 }
   0xa   : > { %718 = vmatprep.subr.bf16.mxu0 (!%p256_p3), %v822_v0  ;;  %380 = vst.msk [vmem:[#allocation4] sm:$0xff] (!%p256_p3), %vm379_vm0, %v822_v0  ;;  %720 = vmatprep.mubr.msk.bf16.mxu0 (!%p256_p3), %vm823_vm1, %v822_v0  ;;  %v824_v4 = vmov (!%p256_p3), -1e+30   ;;  %v436_v5 = vlaneseq (!%p256_p3)  ;;  %v825_v19 = vmov (!%p256_p3), 0   ;;  %vm477_vm3 = vcmask (!%p256_p3), 1043456  }
   0xb   : > { %724 = vmatprep.subr.bf16.mxu1 (!%p256_p3), %v822_v0  ;;  %726 = vmatprep.mubr.msk.bf16.mxu1 (!%p256_p3), %vm823_vm1, %v822_v0  ;;  %377 = vst.msk [vmem:[#allocation2] sm:$0xff] (!%p256_p3), %vm376_vm2, %v824_v4  ;;  %378 = vst.msk [vmem:[#allocation3] sm:$0xff] (!%p256_p3), %vm376_vm2, %v822_v0 }
   0xc   : > { %v437_v8 = vshrl.u32 (!%p256_p3), %v436_v5, 7  ;;  %774 = vset.pattern.permute.xlu0 (!%p256_p3), %v825_v19  ;;  %775 = vset.pattern.permute.xlu1 (!%p256_p3), %v825_v19 }
   0xe   : > { %v438_v10 = vsub.s32 (!%p256_p3), 0, %v437_v8 }
  0x10   : > { %s948_s16 = smov (!%p321_p5, %s808_s16), 1  ;;  %s950_s15 = smov (!%p323_p6, %s804_s15), 3 }
  0x11   : > { %s701_s22 = sshll.u32 %s948_s16, 2  ;;  %s359_s7 = scalar_lea.vmem %s935_s3, %s948_s16  ;;  %v466_v40 = vld [vmem:[#allocation4] sm:$0xff] }
  0x12   : > { %s882_s23 = sadd.s32 %s701_s22, %s950_s15  ;;  %v432_v6 = vld [vmem:[%s359_s7] sm:$0x1]  ;;  %v458_v34 = vld [vmem:[#allocation3] sm:$0xff] }
  0x13   : > { %s885_s24 = sshll.u32 %s882_s23, 2  ;;  %v710_v7 = vadd.f32 -1.0, %v432_v6  ;;  %v442_v20 = vld [vmem:[#allocation2] sm:$0xff]  ;;  %s708_s11 = sshll.u32 %s882_s23, 3 }
  0x14   : > { %s342_s27 = scalar_lea.vmem %s933_s1, %s885_s24  ;;  %s331_s30 = scalar_lea.vmem %s932_s0, %s885_s24 }
  0x15   : > { %v382_v1 = vld [vmem:[%s342_s27] sm:$0xf]  ;;  %v434_v9 = vmul.f32 1e+09, %v710_v7  ;;  %s353_s10 = scalar_lea.vmem %s934_s2, %s885_s24  ;;  %s370_s14 = scalar_lea.vmem %s936_s4, %s708_s11 }
  0x16   : > { %v389_v2 = vsel %vm379_vm0, %v382_v1, 0  ;;  %v381_v3 = vld [vmem:[%s331_s30] sm:$0xf] }
  0x17   : > { %719 = vmatpush3.bf16.xpose.msra.mxu0 %v389_v2  ;;  %v439_v11 = vrot.slane %v434_v9, %v438_v10  ;;  %v383_v24 = vld [vmem:[%s353_s10] sm:$0xf] }
  0x18   : > { %v479_v25 = vsel %vm477_vm3, %v383_v24, 0 }
  0x19   : > { %725 = vmatpush3.bf16.msra.mxu1 %v479_v25 }
  0x1e   : > { %721 = vmatmul.mubr.msk.bf16.vlgmr.msra.gmra.mrb[0].mxu0 %vm379_vm0, %v381_v3 }
  0xf1   : > { %v425_v12 = vpop.f32.mrb[0].mxu0 }
  0xf2   : > { %v431_v13 = vmul.f32 0.35355338, %v425_v12  ;;  %v722_v14 = vpop.f32.mrb[1].mxu0 }
  0xf3   : > { %v428_v15 = vpop.f32.mrb[2].mxu0 }
  0xf4   : > { %v723_v16 = vpop.f32.mrb[3].mxu0  ;;  %v441_v17 = vadd.f32 %v439_v11, %v431_v13 }
  0xf6   : > { %v443_v18 = vsel %vm379_vm0, %v441_v17, -inf }
  0xf7   : > { %444 = vmax.xlane.f32.xlu0 %v443_v18 }
 0x184   : > { %v445_v21 = vpop.xlane.xlu0 %444 }
 0x185   : > { %v446_v22 = vmax.f32 %v442_v20, %v445_v21 }
 0x187   : > { %v447_v23 = vsub.f32 %v442_v20, %v446_v22  ;;  %523 = vst.msk [vmem:[#allocation2] sm:$0xff] %vm376_vm2, %v446_v22  ;;  %452 = vperm.xlu0 %774, %v446_v22  }
 0x189   : > { %v448_v32 = vmul.f32 1.442695, %v447_v23 }
 0x206   : > { %v453_v26 = vpop.permute.xlu0 %452 }
 0x207   : > { %v455_v27 = vsub.f32 %v441_v17, %v453_v26 }
 0x209   : > { %v456_v28 = vmul.f32 1.442695, %v455_v27 }
 0x20b   : > { %776 = vpow2.f32 %v456_v28 }
 0x20c   : > { %778 = vpow2.f32 %v448_v32 }
 0x215   : > { %v777_v29 = vpop.eup %776 }
 0x216   : > { %v460_v30 = vsel %vm379_vm0, %v777_v29, 0.0  ;;  %v473_v31 = vpack.c.bf16 %v777_v29, %v777_v29  ;;  %v779_v33 = vpop.eup %778 }
 0x217   : > { %461 = vadd.xlane.f32.xlu1 %v460_v30  ;;  %v459_v35 = vmul.f32 %v779_v33, %v458_v34 }
 0x218   : > { %727 = vmatmul.mubr.msk.bf16.vlgmr.msra.gmra.mrb[0].mxu1 %vm379_vm0, %v473_v31 }
 0x228   : > { %469 = vperm.xlu1 %775, %v779_v33  }
 0x2a4   : > { %v462_v36 = vpop.xlane.xlu1 %461 }
 0x2a5   : > { %v463_v37 = vadd.f32 %v462_v36, %v459_v35 }
 0x2a7   : > { %465 = vst.msk [vmem:[#allocation3] sm:$0xff] %vm376_vm2, %v463_v37 }
 0x2a8   : > { %v470_v41 = vpop.permute.xlu1 %469 }
 0x2a9   : > { %v472_v42 = vmul.f32 %v470_v41, %v466_v40 }
 0x2ae   : > { %v527_v38 = vld [vmem:[#allocation3] sm:$0xff] }
 0x2af   : > { %780 = vrcp.f32 %v527_v38 }
 0x2b9   : > { %v781_v39 = vpop.eup %780 }
 0x2ba   : > { %532 = vperm.xlu1 %775, %v781_v39  }
 0x2eb   : > { %v515_v43 = vpop.f32.mrb[0].mxu1 }
 0x2ec   : > { %v521_v44 = vadd.f32 %v515_v43, %v472_v42  ;;  %v728_v45 = vpop.f32.mrb[1].mxu1 }
 0x2ed   : > { %v518_v46 = vpop.f32.mrb[2].mxu1 }
 0x2ee   : > { %522 = vst.msk [vmem:[#allocation4] sm:$0xff] %vm379_vm0, %v521_v44  ;;  %v729_v47 = vpop.f32.mrb[3].mxu1 }
 0x2f5   : > { %v529_v48 = vld [vmem:[#allocation4] sm:$0xff] }
 0x339   : > { %v533_v49 = vpop.permute.xlu1 %532 }
 0x33a   : > { %v535_v50 = vmul.f32 %v533_v49, %v529_v48 }
 0x33c   : > { %536 = vst.msk [vmem:[%s370_s14] sm:$0xff] %vm379_vm0, %v535_v50 }
 0x33d PF: > { %s14_s19 = sadd.s32 1, %s820_s19   ;;  %s937_s15 = smov %s812_s17 }
 0x33e   : > { %p11_p7 = scmp.ge.s32.totalorder %s14_s19, 10   ;;  %s938_s16 = smov %s816_s18 }
 0x33f   : > { %s939_s17 = smov %s942_s20  ;;  %s940_s18 = smov %s946_s21 }
 0x340   :  { %13 = sbr.rel (!%p11_p7) target bundleno = 3 (0x3), region = 83 }

// kernel: transformer_forward.25
= control target key start
LH: loop header
LB: loop body
LE: loop exit
PB: predicated region body
PF: predicated region fallthrough
CT: control target
= control target key end

     0   :  { %vm19_vm0 = vcmask 261120   ;;  %v164_v0 = vmov 0.0   ;;  %vm165_vm1 = vmmov 0   ;;  %vm63_vm2 = vcmask 523264   ;;  %s240_s1 = inlined_call_operand.vmem [shape: bf16[64,32], index: 1, kind: input, shape index: {}]   ;;  %s241_s3 = inlined_call_operand.vmem [shape: f32[16,32], index: 3, kind: output, shape index: {}]   ;;  %s242_s0 = inlined_call_operand.vmem [shape: bf16[16,64], index: 0, kind: input, shape index: {}]   ;;  %s243_s2 = inlined_call_operand.vmem [shape: f32[1,32], index: 2, kind: input, shape index: {}]  }
   0x1   :  { %145 = vmatprep.subr.bf16.mxu0 %v164_v0  ;;  %v159_v1 = vld [vmem:[%s240_s1] sm:$0xff]   ;;  %153 = vmatprep.mubr.msk.bf16.mxu0 %vm165_vm1, %v164_v0  ;;  %20 = vst.msk [vmem:[%s241_s3] sm:$0xff] %vm19_vm0, %v164_v0  ;;  %21 = vst.msk [vmem:[%s241_s3 + $0x8] sm:$0xff] %vm19_vm0, %v164_v0  ;;  %v160_v2 = vld [vmem:[%s240_s1 + $0x8] sm:$0xff]  }
   0x2   :  { %146 = vmatpush3.bf16.msra.mxu0 %v159_v1  ;;  %v161_v3 = vld [vmem:[%s240_s1 + $0x10] sm:$0xff]   ;;  %v162_v4 = vld [vmem:[%s240_s1 + $0x18] sm:$0xff]   ;;  %v163_v5 = vld [vmem:[%s242_s0] sm:$0xff]  }
   0x3   :  { %147 = vmatprep.subr.bf16.mxu0 %v164_v0  ;;  %v139_v14 = vld [vmem:[%s243_s2] ss:$0 sm:$0xff] }
   0x6   :  { %148 = vmatpush3.bf16.msra.mxu0 %v160_v2 }
   0x7   :  { %149 = vmatprep.subr.bf16.mxu0 %v164_v0 }
   0x8   :  { %v22_v6 = vld [vmem:[%s241_s3] sm:$0xff]  ;;  %v23_v8 = vld [vmem:[%s241_s3 + $0x8] sm:$0xff] }
   0xa   :  { %150 = vmatpush3.bf16.msra.mxu0 %v161_v3 }
   0xb   :  { %151 = vmatprep.subr.bf16.mxu0 %v164_v0 }
   0xe   :  { %152 = vmatpush3.bf16.msra.mxu0 %v162_v4 }
  0x11   :  { %154 = vmatmul.mubr.msk.bf16.vlgmr.msra.gmra.mrb[0].mxu0 %vm63_vm2, %v163_v5 }
  0xe4   :  { %v101_v7 = vpop.f32.mrb[0].mxu0 }
  0xe5   :  { %v108_v9 = vadd.f32 %v101_v7, %v22_v6  ;;  %v155_v10 = vpop.f32.mrb[1].mxu0 }
  0xe6   :  { %v104_v11 = vpop.f32.mrb[2].mxu0 }
  0xe7   :  { %111 = vst.msk [vmem:[%s241_s3] sm:$0xff] %vm19_vm0, %v108_v9  ;;  %v109_v12 = vadd.f32 %v104_v11, %v23_v8  ;;  %v156_v13 = vpop.f32.mrb[3].mxu0 }
  0xe9   :  { %112 = vst.msk [vmem:[%s241_s3 + $0x8] sm:$0xff] %vm19_vm0, %v109_v12 }
  0xee   :  { %v116_v15 = vld [vmem:[%s241_s3] sm:$0xff] }
  0xef   :  { %v125_v16 = vadd.f32 %v139_v14, %v116_v15 }
  0xf0   :  { %v117_v17 = vld [vmem:[%s241_s3 + $0x8] sm:$0xff] }
  0xf1   :  { %127 = vst.msk [vmem:[%s241_s3] sm:$0xff] %vm19_vm0, %v125_v16  ;;  %v126_v18 = vadd.f32 %v139_v14, %v117_v17 }
  0xf3   :  { %128 = vst.msk [vmem:[%s241_s3 + $0x8] sm:$0xff] %vm19_vm0, %v126_v18 }

// kernel: transformer_forward.24
= control target key start
LH: loop header
LB: loop body
LE: loop exit
PB: predicated region body
PF: predicated region fallthrough
CT: control target
= control target key end

     0   :  { %vm19_vm0 = vcmask 523264   ;;  %v140_v0 = vmov 0.0   ;;  %vm141_vm1 = vmmov 0   ;;  %vm47_vm2 = vcmask 261120   ;;  %s210_s3 = inlined_call_operand.vmem [shape: f32[16,64], index: 3, kind: output, shape index: {}]   ;;  %s211_s1 = inlined_call_operand.vmem [shape: bf16[32,64], index: 1, kind: input, shape index: {}]   ;;  %s212_s0 = inlined_call_operand.vmem [shape: bf16[16,32], index: 0, kind: input, shape index: {}]   ;;  %s213_s2 = inlined_call_operand.vmem [shape: f32[1,64], index: 2, kind: input, shape index: {}]  }
   0x1   :  { %20 = vst.msk [vmem:[%s210_s3] sm:$0xff] %vm19_vm0, %v140_v0  ;;  %21 = vst.msk [vmem:[%s210_s3 + $0x8] sm:$0xff] %vm19_vm0, %v140_v0  ;;  %127 = vmatprep.subr.bf16.mxu0 %v140_v0  ;;  %v137_v1 = vld [vmem:[%s211_s1] sm:$0xff]   ;;  %131 = vmatprep.mubr.msk.bf16.mxu0 %vm141_vm1, %v140_v0  ;;  %v138_v2 = vld [vmem:[%s211_s1 + $0x8] sm:$0xff]  }
   0x2   :  { %128 = vmatpush3.bf16.msra.mxu0 %v137_v1  ;;  %v139_v3 = vld [vmem:[%s212_s0] sm:$0xff]  }
   0x3   :  { %129 = vmatprep.subr.bf16.mxu0 %v140_v0  ;;  %v123_v12 = vld [vmem:[%s213_s2] ss:$0 sm:$0xff] }
   0x6   :  { %130 = vmatpush3.bf16.msra.mxu0 %v138_v2 }
   0x8   :  { %v22_v4 = vld [vmem:[%s210_s3] sm:$0xff]  ;;  %v23_v6 = vld [vmem:[%s210_s3 + $0x8] sm:$0xff] }
   0x9   :  { %132 = vmatmul.mubr.msk.bf16.vlgmr.msra.gmra.mrb[0].mxu0 %vm47_vm2, %v139_v3 }
  0xdc   :  { %v85_v5 = vpop.f32.mrb[0].mxu0 }
  0xdd   :  { %v92_v7 = vadd.f32 %v85_v5, %v22_v4  ;;  %v133_v8 = vpop.f32.mrb[1].mxu0 }
  0xde   :  { %v88_v9 = vpop.f32.mrb[2].mxu0 }
  0xdf   :  { %95 = vst.msk [vmem:[%s210_s3] sm:$0xff] %vm19_vm0, %v92_v7  ;;  %v93_v10 = vadd.f32 %v88_v9, %v23_v6  ;;  %v134_v11 = vpop.f32.mrb[3].mxu0 }
  0xe1   :  { %96 = vst.msk [vmem:[%s210_s3 + $0x8] sm:$0xff] %vm19_vm0, %v93_v10 }
  0xe6   :  { %v100_v13 = vld [vmem:[%s210_s3] sm:$0xff] }
  0xe7   :  { %v109_v14 = vadd.f32 %v123_v12, %v100_v13 }
  0xe8   :  { %v101_v15 = vld [vmem:[%s210_s3 + $0x8] sm:$0xff] }
  0xe9   :  { %v111_v16 = vmax.f32 %v109_v14, 0.0  ;;  %v110_v17 = vadd.f32 %v123_v12, %v101_v15 }
  0xeb   :  { %113 = vst.msk [vmem:[%s210_s3] sm:$0xff] %vm19_vm0, %v111_v16  ;;  %v112_v18 = vmax.f32 %v110_v17, 0.0 }
  0xed   :  { %114 = vst.msk [vmem:[%s210_s3 + $0x8] sm:$0xff] %vm19_vm0, %v112_v18 }

// kernel: transformer_forward.32
= control target key start
LH: loop header
LB: loop body
LE: loop exit
PB: predicated region body
PF: predicated region fallthrough
CT: control target
= control target key end

     0   :  { %vm19_vm0 = vcmask 523264   ;;  %v138_v0 = vmov 0.0   ;;  %vm139_vm1 = vmmov 0   ;;  %vm47_vm2 = vcmask 261120   ;;  %s208_s3 = inlined_call_operand.vmem [shape: f32[16,64], index: 3, kind: output, shape index: {}]   ;;  %s209_s1 = inlined_call_operand.vmem [shape: bf16[32,64], index: 1, kind: input, shape index: {}]   ;;  %s210_s0 = inlined_call_operand.vmem [shape: bf16[16,32], index: 0, kind: input, shape index: {}]   ;;  %s211_s2 = inlined_call_operand.vmem [shape: f32[1,64], index: 2, kind: input, shape index: {}]  }
   0x1   :  { %20 = vst.msk [vmem:[%s208_s3] sm:$0xff] %vm19_vm0, %v138_v0  ;;  %21 = vst.msk [vmem:[%s208_s3 + $0x8] sm:$0xff] %vm19_vm0, %v138_v0  ;;  %125 = vmatprep.subr.bf16.mxu0 %v138_v0  ;;  %v135_v1 = vld [vmem:[%s209_s1] sm:$0xff]   ;;  %129 = vmatprep.mubr.msk.bf16.mxu0 %vm139_vm1, %v138_v0  ;;  %v136_v2 = vld [vmem:[%s209_s1 + $0x8] sm:$0xff]  }
   0x2   :  { %126 = vmatpush3.bf16.msra.mxu0 %v135_v1  ;;  %v137_v3 = vld [vmem:[%s210_s0] sm:$0xff]  }
   0x3   :  { %127 = vmatprep.subr.bf16.mxu0 %v138_v0  ;;  %v121_v12 = vld [vmem:[%s211_s2] ss:$0 sm:$0xff] }
   0x6   :  { %128 = vmatpush3.bf16.msra.mxu0 %v136_v2 }
   0x8   :  { %v22_v4 = vld [vmem:[%s208_s3] sm:$0xff]  ;;  %v23_v6 = vld [vmem:[%s208_s3 + $0x8] sm:$0xff] }
   0x9   :  { %130 = vmatmul.mubr.msk.bf16.vlgmr.msra.gmra.mrb[0].mxu0 %vm47_vm2, %v137_v3 }
  0xdc   :  { %v85_v5 = vpop.f32.mrb[0].mxu0 }
  0xdd   :  { %v92_v7 = vadd.f32 %v85_v5, %v22_v4  ;;  %v131_v8 = vpop.f32.mrb[1].mxu0 }
  0xde   :  { %v88_v9 = vpop.f32.mrb[2].mxu0 }
  0xdf   :  { %95 = vst.msk [vmem:[%s208_s3] sm:$0xff] %vm19_vm0, %v92_v7  ;;  %v93_v10 = vadd.f32 %v88_v9, %v23_v6  ;;  %v132_v11 = vpop.f32.mrb[3].mxu0 }
  0xe1   :  { %96 = vst.msk [vmem:[%s208_s3 + $0x8] sm:$0xff] %vm19_vm0, %v93_v10 }
  0xe6   :  { %v100_v13 = vld [vmem:[%s208_s3] sm:$0xff] }
  0xe7   :  { %v109_v14 = vadd.f32 %v121_v12, %v100_v13 }
  0xe8   :  { %v101_v15 = vld [vmem:[%s208_s3 + $0x8] sm:$0xff] }
  0xe9   :  { %111 = vst.msk [vmem:[%s208_s3] sm:$0xff] %vm19_vm0, %v109_v14  ;;  %v110_v16 = vadd.f32 %v121_v12, %v101_v15 }
  0xeb   :  { %112 = vst.msk [vmem:[%s208_s3 + $0x8] sm:$0xff] %vm19_vm0, %v110_v16 }

// kernel: transformer_forward.39
= control target key start
LH: loop header
LB: loop body
LE: loop exit
PB: predicated region body
PF: predicated region fallthrough
CT: control target
= control target key end

     0   :  { %v178_v1 = vmov 0.0   ;;  %vm179_vm0 = vmmov 0   ;;  %vm20_vm1 = vcmask 130048   ;;  %s233_s0 = inlined_call_operand.vmem [shape: bf16[16,32], index: 0, kind: input, shape index: {}]   ;;  %s234_s1 = inlined_call_operand.vmem [shape: bf16[32,16], index: 1, kind: input, shape index: {}]   ;;  %s235_s2 = inlined_call_operand.vmem [shape: f32[1,16], index: 2, kind: input, shape index: {}]   ;;  %s236_s3 = inlined_call_operand.hbm [shape: f32[16,16], index: 3, kind: output, shape index: {}]  }
   0x1   :  { %v151_v0 = vld [vmem:[%s234_s1] sm:$0xff]   ;;  %138 = vmatprep.subr.bf16.mxu0 %v178_v1  ;;  %v152_v2 = vld [vmem:[%s234_s1 + $0x8] sm:$0xff]   ;;  %142 = vmatprep.mubr.msk.bf16.mxu0 %vm179_vm0, %v178_v1 }
   0x2   :  { %139 = vmatpush3.bf16.msra.mxu0 %v151_v0 }
   0x3   :  { %140 = vmatprep.subr.bf16.mxu0 %v178_v1 }
   0x4   :  { %8 = vsyncpa [#allocation3], 0  ;;  %21 = vst.msk [vmem:[#allocation2] sm:$0xff] %vm20_vm1, %v178_v1  ;;  %v153_v3 = vld [vmem:[%s233_s0] sm:$0xff]   ;;  %vm48_vm2 = vcmask 261120   ;;  %s180_s0 = smov [#allocation2]  }
   0x5   :  { %22 = vst.msk [vmem:[#allocation2 + $0x8] sm:$0xff] %vm20_vm1, %v178_v1  ;;  %v134_v12 = vld [vmem:[%s235_s2] ss:$0 sm:$0xff]  ;;  %s119_s19 = sshll.u32 %s180_s0, 4  ;;  %s120_s19 = int_to_ptr.vmem [resolvable:$true] %s119_s19 }
   0x6   :  { %141 = vmatpush3.bf16.msra.mxu0 %v152_v2  ;;  %s154_s20 = scalar_lea.vmem %s120_s19, 256  ;;  %p159_p1 = scmp.lt.s32.totalorder %s120_s19, %s120_s19 }
   0x7   :  { %p155_p0 = scmp.ne.s32.totalorder %s120_s19, %s154_s20  ;;  %p160_p2 = scmp.lt.s32.totalorder %s154_s20, %s154_s20 }
   0x9   :  { %143 = vmatmul.mubr.msk.bf16.vlgmr.msra.gmra.mrb[0].mxu0 %vm48_vm2, %v153_v3  ;;  %p161_p3 = por %p160_p2, %p159_p1 }
   0xb   :  { %v23_v4 = vld [vmem:[#allocation2] sm:$0xff]  ;;  %p162_p4 = pnand %p161_p3, %p155_p0 }
   0xc   :  { %v24_v6 = vld [vmem:[#allocation2 + $0x8] sm:$0xff] }
  0xdc   :  { %v86_v5 = vpop.f32.mrb[0].mxu0 }
  0xdd   :  { %v93_v7 = vadd.f32 %v86_v5, %v23_v4  ;;  %v144_v8 = vpop.f32.mrb[1].mxu0 }
  0xde   :  { %v89_v9 = vpop.f32.mrb[2].mxu0 }
  0xdf   :  { %96 = vst.msk [vmem:[#allocation2] sm:$0xff] %vm20_vm1, %v93_v7  ;;  %v94_v10 = vadd.f32 %v89_v9, %v24_v6  ;;  %v145_v11 = vpop.f32.mrb[3].mxu0 }
  0xe1   :  { %97 = vst.msk [vmem:[#allocation2 + $0x8] sm:$0xff] %vm20_vm1, %v94_v10 }
  0xe6   :  { %v101_v13 = vld [vmem:[#allocation2] sm:$0xff] }
  0xe7   :  { %v110_v14 = vadd.f32 %v134_v12, %v101_v13 }
  0xe8   :  { %v102_v15 = vld [vmem:[#allocation2 + $0x8] sm:$0xff] }
  0xe9   :  { %v111_v16 = vadd.f32 %v134_v12, %v102_v15  ;;  %112 = vst.msk [vmem:[#allocation2] sm:$0xff] %vm20_vm1, %v110_v14 }
  0xeb   :  { %113 = vst.msk [vmem:[#allocation2 + $0x8] sm:$0xff] %vm20_vm1, %v111_v16 }
  0xec   :  { %165 = shalt.err (!%p162_p4)
}
  0xed   :  { %s166_s22 = scalar_lea.hbm %s236_s3, 256 }
  0xee   :  { %p167_p5 = scmp.ne.s32.totalorder %s236_s3, %s166_s22  ;;  %p170_p6 = scmp.lt.u32.totalorder %s166_s22, %s236_s3 }
  0xf0   :  { %p172_p7 = pnand %p170_p6, %p167_p5 }
  0xf2   :  { %175 = shalt.err (!%p172_p7)
}
  0xf3   :  { %s181_s27 = smov 128   ;;  %s182_s28 = smov 8  }
  0xf4   :  { %125 = dma.vmem_to_hbm [thread:$0]  %s120_s19, 256, %s236_s3, [#allocation3], %s181_s27, %s181_s27, %s182_s28  }
  0xf5   :  { %176 = dma.done.wait [#allocation3], 256  }
  0xf6   :  { %177 = vsyncadd [#allocation3], 4294967040 }
  0xf7   :  { %129 = vsyncpa [#allocation3], 1 }

</bundles_post_ra>
